<compile_context>
chip_gen: v7x
topology: tpu7x:2x2x1
jax: 0.10.0
libtpu: 0.0.40
codegen_flags: <defaults>
</compile_context>

<pallas_src>
import functools
import math

import jax
import jax.numpy as jnp
from jax.experimental import pallas as pl
from jax.experimental.pallas import tpu as pltpu


def _round_up(x, m):
    return ((x + m - 1) // m) * m


def _cdiv(a, b):
    return -(-a // b)


def _leaky_relu(x, slope=0.2):
    return jnp.where(x > 0, x, slope * x)


# ---------------------------------------------------------------------------
# Kernel: fused 5-layer MLP on one (TM, latent_padded) batch tile.
# Weights arrive pre-cast to bf16 (half the DMA bytes, 2x MXU throughput on
# v6e/v7x); biases are f32. All accumulations / activations are f32.
# ---------------------------------------------------------------------------
def generator_kernel(z_ref,
                     w1_ref, b1_ref,
                     w2_ref, b2_ref,
                     w3_ref, b3_ref,
                     w4_ref, b4_ref,
                     w5_ref, b5_ref,
                     out_ref):
    def linear(h_bf16, w_ref, b_ref):
        acc = jnp.dot(h_bf16, w_ref[...], preferred_element_type=jnp.float32)
        return acc + b_ref[...]                       # f32 accumulate + bias

    h = z_ref[...].astype(jnp.bfloat16)
    h = _leaky_relu(linear(h, w1_ref, b1_ref)).astype(jnp.bfloat16)
    h = _leaky_relu(linear(h, w2_ref, b2_ref)).astype(jnp.bfloat16)
    h = _leaky_relu(linear(h, w3_ref, b3_ref)).astype(jnp.bfloat16)
    h = _leaky_relu(linear(h, w4_ref, b4_ref)).astype(jnp.bfloat16)
    # TODO(synk): for very large prod(img_shape) (e.g. 3x64x64 on v7x), chunk
    # this final linear+tanh+store over ~512-lane slices of W5/out (and/or
    # single-buffer the constant weight specs) to bound the live f32 tile
    # inside v7x's smaller VMEM instead of materializing (TM, out_dim_p) f32.
    out_ref[...] = jnp.tanh(linear(h, w5_ref, b5_ref)).astype(out_ref.dtype)


# ---------------------------------------------------------------------------
# One-time parameter layout prep (call ONCE, reuse across forward calls).
# ---------------------------------------------------------------------------
def prepare_params(params, latent_dim, img_shape):
    """bf16-cast weights; pad W1 rows to lane-dense K=128; pad W5/b5 output
    columns to a multiple of 128 so the kernel's writeback is unmasked."""
    out_dim = math.prod(img_shape)
    out_dim_p = _round_up(out_dim, 128)
    lat_p = _round_up(latent_dim, 128)
    prepped = []
    n = len(params)
    for li, (w, b) in enumerate(params):
        w = jnp.asarray(w, jnp.float32)
        b = jnp.asarray(b, jnp.float32).reshape(1, -1)
        if li == 0 and w.shape[0] != lat_p:
            w = jnp.pad(w, ((0, lat_p - w.shape[0]), (0, 0)))
        if li == n - 1 and w.shape[1] != out_dim_p:
            pad = out_dim_p - w.shape[1]
            w = jnp.pad(w, ((0, 0), (0, pad)))        # tanh(0)=0 in pad cols
            b = jnp.pad(b, ((0, 0), (0, pad)))
        prepped.append((w.astype(jnp.bfloat16), b.astype(jnp.float32)))
    return tuple(prepped)


def _pick_tiling(batch, block_m):
    """Rows-per-step (tm, multiple of 8) and number of grid steps.

    Tight tiling: tm ~= ceil(batch / n_steps) so odd batches don't waste MXU
    work on zero rows; n_steps >= 2 whenever possible so v7x megacore can
    shard the 'parallel' batch axis across both TensorCores."""
    rows8 = _round_up(batch, 8)
    n_steps = max(_cdiv(batch, block_m), 2)     # want >= 2 steps (megacore)
    n_steps = min(n_steps, rows8 // 8)          # but each tile >= 8 rows
    n_steps = max(n_steps, 1)
    tm = _round_up(_cdiv(batch, n_steps), 8)
    return tm, n_steps


@functools.partial(jax.jit, static_argnames=("img_shape", "block_m"))
def generator_forward(z, prepped_params, img_shape, block_m=512):
    """z: (B, latent_dim) f32. prepped_params: output of prepare_params()."""
    batch, latent_dim = z.shape
    out_dim = math.prod(img_shape)
    lat_p = prepped_params[0][0].shape[0]       # padded K of layer 1
    out_dim_p = prepped_params[-1][0].shape[1]  # padded output features

    # Lane-dense K for the first matmul (cheap: B x (lat_p - latent) f32).
    if lat_p != latent_dim:
        z = jnp.pad(z, ((0, 0), (0, lat_p - latent_dim)))

    tm, n_steps = _pick_tiling(batch, block_m)
    batch_padded = tm * n_steps
    if batch_padded != batch:
        z = jnp.pad(z, ((0, batch_padded - batch), (0, 0)))

    flat_args = [z]
    in_specs = [pl.BlockSpec((tm, lat_p), lambda i: (i, 0))]
    for (w, b) in prepped_params:
        flat_args.append(w)
        flat_args.append(b)
        # Constant index_map -> fetched once, VMEM-resident for the whole grid.
        in_specs.append(pl.BlockSpec(w.shape, lambda i: (0, 0)))
        in_specs.append(pl.BlockSpec(b.shape, lambda i: (0, 0)))

    img_flat = pl.pallas_call(
        generator_kernel,
        out_shape=jax.ShapeDtypeStruct((batch_padded, out_dim_p), jnp.float32),
        grid=(n_steps,),
        in_specs=in_specs,
        out_specs=pl.BlockSpec((tm, out_dim_p), lambda i: (i, 0)),
        compiler_params=pltpu.CompilerParams(
            dimension_semantics=("parallel",)),   # v7x: shard batch over TCs
    )(*flat_args)

    return img_flat[:batch, :out_dim].reshape(batch, *img_shape)


# ---------------------------------------------------------------------------
# Init + pure-JAX reference for the sanity check.
# ---------------------------------------------------------------------------
def init_params(key, latent_dim, img_shape):
    """Deterministic init mimicking PyTorch Linear's U(-1/sqrt(fan_in), +)."""
    out_dim = math.prod(img_shape)
    dims = [latent_dim, 128, 256, 512, 1024, out_dim]
    params = []
    for i in range(len(dims) - 1):
        fan_in, fan_out = dims[i], dims[i + 1]
        key, kw, kb = jax.random.split(key, 3)
        bound = 1.0 / (fan_in ** 0.5)
        w = jax.random.uniform(kw, (fan_in, fan_out), jnp.float32,
                               minval=-bound, maxval=bound)
        b = jax.random.uniform(kb, (1, fan_out), jnp.float32,
                               minval=-bound, maxval=bound)
        params.append((w, b))
    return params


def _reference_forward(z, params, img_shape):
    h = z
    for (w, b) in params[:4]:
        h = jnp.dot(h, w) + b
        h = jnp.where(h > 0, h, 0.2 * h)
    w5, b5 = params[4]
    out = jnp.tanh(jnp.dot(h, w5) + b5)
    return out.reshape(z.shape[0], *img_shape)


if __name__ == "__main__":
    latent_dim = 32
    img_shape = (1, 8, 8)   # prod = 64 -> padded to 128 lanes in prep
    batch = 24              # tight tiling -> tm=16, grid=2, pads 8 rows

    key = jax.random.PRNGKey(0)
    key, zk = jax.random.split(key)
    z = jax.random.normal(zk, (batch, latent_dim), dtype=jnp.float32)

    params = init_params(key, latent_dim, img_shape)          # f32 "training" copy
    prepped = prepare_params(params, latent_dim, img_shape)   # one-time layout prep

    img = generator_forward(z, prepped, img_shape)
    img = jax.block_until_ready(img)

    assert img.shape == (batch,) + img_shape, img.shape
    assert bool(jnp.all(jnp.isfinite(img)))
    # tanh output range sanity check
    assert bool(jnp.all(jnp.abs(img) <= 1.0 + 1e-6))

    # bf16-matmul / f32-accumulate vs pure f32 reference: loose tolerance.
    ref = _reference_forward(z, params, img_shape)
    max_err = float(jnp.max(jnp.abs(img - ref)))
    assert max_err < 5e-2, max_err

    print("KERNEL_OK")
</pallas_src>

<mosaic_0001>
module attributes {stable_mosaic.version = 11 : i64} {
  func.func @generator_kernel(%arg0: i32, %arg1: memref<16x128xf32, #tpu.memory_space<vmem>>, %arg2: memref<128x128xbf16, #tpu.memory_space<vmem>>, %arg3: memref<1x128xf32, #tpu.memory_space<vmem>>, %arg4: memref<128x256xbf16, #tpu.memory_space<vmem>>, %arg5: memref<1x256xf32, #tpu.memory_space<vmem>>, %arg6: memref<256x512xbf16, #tpu.memory_space<vmem>>, %arg7: memref<1x512xf32, #tpu.memory_space<vmem>>, %arg8: memref<512x1024xbf16, #tpu.memory_space<vmem>>, %arg9: memref<1x1024xf32, #tpu.memory_space<vmem>>, %arg10: memref<1024x128xbf16, #tpu.memory_space<vmem>>, %arg11: memref<1x128xf32, #tpu.memory_space<vmem>>, %arg12: memref<16x128xf32, #tpu.memory_space<vmem>>) attributes {dimension_semantics = [#tpu.dimension_semantics<parallel>], iteration_bounds = array<i64: 2>, scalar_prefetch = 0 : i64, scratch_operands = 0 : i64, tpu.core_type = #tpu.core_type<tc>, window_params = [{transform_indices = @transform_0, window_bounds = array<i64: 16, 128>}, {pipeline_mode = #tpu.pipeline_mode<synchronous>, transform_indices = @transform_1, window_bounds = array<i64: 128, 128>}, {pipeline_mode = #tpu.pipeline_mode<synchronous>, transform_indices = @transform_2, window_bounds = array<i64: 1, 128>}, {pipeline_mode = #tpu.pipeline_mode<synchronous>, transform_indices = @transform_3, window_bounds = array<i64: 128, 256>}, {pipeline_mode = #tpu.pipeline_mode<synchronous>, transform_indices = @transform_4, window_bounds = array<i64: 1, 256>}, {pipeline_mode = #tpu.pipeline_mode<synchronous>, transform_indices = @transform_5, window_bounds = array<i64: 256, 512>}, {pipeline_mode = #tpu.pipeline_mode<synchronous>, transform_indices = @transform_6, window_bounds = array<i64: 1, 512>}, {pipeline_mode = #tpu.pipeline_mode<synchronous>, transform_indices = @transform_7, window_bounds = array<i64: 512, 1024>}, {pipeline_mode = #tpu.pipeline_mode<synchronous>, transform_indices = @transform_8, window_bounds = array<i64: 1, 1024>}, {pipeline_mode = #tpu.pipeline_mode<synchronous>, transform_indices = @transform_9, window_bounds = array<i64: 1024, 128>}, {pipeline_mode = #tpu.pipeline_mode<synchronous>, transform_indices = @transform_10, window_bounds = array<i64: 1, 128>}, {transform_indices = @transform_11, window_bounds = array<i64: 16, 128>}]} {
    %c0 = arith.constant 0 : index
    %c0_0 = arith.constant 0 : index
    %0 = vector.load %arg1[%c0, %c0_0] : memref<16x128xf32, #tpu.memory_space<vmem>>, vector<16x128xf32>
    %1 = arith.truncf %0 : vector<16x128xf32> to vector<16x128xbf16>
    %c0_1 = arith.constant 0 : index
    %c0_2 = arith.constant 0 : index
    %2 = vector.load %arg2[%c0_1, %c0_2] : memref<128x128xbf16, #tpu.memory_space<vmem>>, vector<128x128xbf16>
    %cst = arith.constant dense<0.000000e+00> : vector<16x128xf32>
    %3 = tpu.matmul %1, %2, %cst {dimension_numbers = #tpu.dot_dimension_numbers<[1], [0], [0], [1], [0, 0, 1, 1], [], []>} : vector<16x128xbf16>, vector<128x128xbf16>, vector<16x128xf32> -> vector<16x128xf32>
    %c0_3 = arith.constant 0 : index
    %c0_4 = arith.constant 0 : index
    %4 = vector.load %arg3[%c0_3, %c0_4] : memref<1x128xf32, #tpu.memory_space<vmem>>, vector<1x128xf32>
    %5 = vector.broadcast %4 : vector<1x128xf32> to vector<16x128xf32>
    %6 = arith.addf %3, %5 : vector<16x128xf32>
    %cst_5 = arith.constant 0.000000e+00 : f32
    %7 = vector.broadcast %cst_5 : f32 to vector<16x128xf32>
    %8 = arith.cmpf ogt, %6, %7 : vector<16x128xf32>
    %cst_6 = arith.constant 2.000000e-01 : f32
    %9 = vector.broadcast %cst_6 : f32 to vector<16x128xf32>
    %10 = arith.mulf %9, %6 : vector<16x128xf32>
    %11 = arith.select %8, %6, %10 : vector<16x128xi1>, vector<16x128xf32>
    %12 = arith.truncf %11 : vector<16x128xf32> to vector<16x128xbf16>
    %c0_7 = arith.constant 0 : index
    %c0_8 = arith.constant 0 : index
    %13 = vector.load %arg4[%c0_7, %c0_8] : memref<128x256xbf16, #tpu.memory_space<vmem>>, vector<128x256xbf16>
    %cst_9 = arith.constant dense<0.000000e+00> : vector<16x256xf32>
    %14 = tpu.matmul %12, %13, %cst_9 {dimension_numbers = #tpu.dot_dimension_numbers<[1], [0], [0], [1], [0, 0, 1, 1], [], []>} : vector<16x128xbf16>, vector<128x256xbf16>, vector<16x256xf32> -> vector<16x256xf32>
    %c0_10 = arith.constant 0 : index
    %c0_11 = arith.constant 0 : index
    %15 = vector.load %arg5[%c0_10, %c0_11] : memref<1x256xf32, #tpu.memory_space<vmem>>, vector<1x256xf32>
    %16 = vector.broadcast %15 : vector<1x256xf32> to vector<16x256xf32>
    %17 = arith.addf %14, %16 : vector<16x256xf32>
    %cst_12 = arith.constant 0.000000e+00 : f32
    %18 = vector.broadcast %cst_12 : f32 to vector<16x256xf32>
    %19 = arith.cmpf ogt, %17, %18 : vector<16x256xf32>
    %cst_13 = arith.constant 2.000000e-01 : f32
    %20 = vector.broadcast %cst_13 : f32 to vector<16x256xf32>
    %21 = arith.mulf %20, %17 : vector<16x256xf32>
    %22 = arith.select %19, %17, %21 : vector<16x256xi1>, vector<16x256xf32>
    %23 = arith.truncf %22 : vector<16x256xf32> to vector<16x256xbf16>
    %c0_14 = arith.constant 0 : index
    %c0_15 = arith.constant 0 : index
    %24 = vector.load %arg6[%c0_14, %c0_15] : memref<256x512xbf16, #tpu.memory_space<vmem>>, vector<256x512xbf16>
    %cst_16 = arith.constant dense<0.000000e+00> : vector<16x512xf32>
    %25 = tpu.matmul %23, %24, %cst_16 {dimension_numbers = #tpu.dot_dimension_numbers<[1], [0], [0], [1], [0, 0, 1, 1], [], []>} : vector<16x256xbf16>, vector<256x512xbf16>, vector<16x512xf32> -> vector<16x512xf32>
    %c0_17 = arith.constant 0 : index
    %c0_18 = arith.constant 0 : index
    %26 = vector.load %arg7[%c0_17, %c0_18] : memref<1x512xf32, #tpu.memory_space<vmem>>, vector<1x512xf32>
    %27 = vector.broadcast %26 : vector<1x512xf32> to vector<16x512xf32>
    %28 = arith.addf %25, %27 : vector<16x512xf32>
    %cst_19 = arith.constant 0.000000e+00 : f32
    %29 = vector.broadcast %cst_19 : f32 to vector<16x512xf32>
    %30 = arith.cmpf ogt, %28, %29 : vector<16x512xf32>
    %cst_20 = arith.constant 2.000000e-01 : f32
    %31 = vector.broadcast %cst_20 : f32 to vector<16x512xf32>
    %32 = arith.mulf %31, %28 : vector<16x512xf32>
    %33 = arith.select %30, %28, %32 : vector<16x512xi1>, vector<16x512xf32>
    %34 = arith.truncf %33 : vector<16x512xf32> to vector<16x512xbf16>
    %c0_21 = arith.constant 0 : index
    %c0_22 = arith.constant 0 : index
    %35 = vector.load %arg8[%c0_21, %c0_22] : memref<512x1024xbf16, #tpu.memory_space<vmem>>, vector<512x1024xbf16>
    %cst_23 = arith.constant dense<0.000000e+00> : vector<16x1024xf32>
    %36 = tpu.matmul %34, %35, %cst_23 {dimension_numbers = #tpu.dot_dimension_numbers<[1], [0], [0], [1], [0, 0, 1, 1], [], []>} : vector<16x512xbf16>, vector<512x1024xbf16>, vector<16x1024xf32> -> vector<16x1024xf32>
    %c0_24 = arith.constant 0 : index
    %c0_25 = arith.constant 0 : index
    %37 = vector.load %arg9[%c0_24, %c0_25] : memref<1x1024xf32, #tpu.memory_space<vmem>>, vector<1x1024xf32>
    %38 = vector.broadcast %37 : vector<1x1024xf32> to vector<16x1024xf32>
    %39 = arith.addf %36, %38 : vector<16x1024xf32>
    %cst_26 = arith.constant 0.000000e+00 : f32
    %40 = vector.broadcast %cst_26 : f32 to vector<16x1024xf32>
    %41 = arith.cmpf ogt, %39, %40 : vector<16x1024xf32>
    %cst_27 = arith.constant 2.000000e-01 : f32
    %42 = vector.broadcast %cst_27 : f32 to vector<16x1024xf32>
    %43 = arith.mulf %42, %39 : vector<16x1024xf32>
    %44 = arith.select %41, %39, %43 : vector<16x1024xi1>, vector<16x1024xf32>
    %45 = arith.truncf %44 : vector<16x1024xf32> to vector<16x1024xbf16>
    %c0_28 = arith.constant 0 : index
    %c0_29 = arith.constant 0 : index
    %46 = vector.load %arg10[%c0_28, %c0_29] : memref<1024x128xbf16, #tpu.memory_space<vmem>>, vector<1024x128xbf16>
    %cst_30 = arith.constant dense<0.000000e+00> : vector<16x128xf32>
    %47 = tpu.matmul %45, %46, %cst_30 {dimension_numbers = #tpu.dot_dimension_numbers<[1], [0], [0], [1], [0, 0, 1, 1], [], []>} : vector<16x1024xbf16>, vector<1024x128xbf16>, vector<16x128xf32> -> vector<16x128xf32>
    %c0_31 = arith.constant 0 : index
    %c0_32 = arith.constant 0 : index
    %48 = vector.load %arg11[%c0_31, %c0_32] : memref<1x128xf32, #tpu.memory_space<vmem>>, vector<1x128xf32>
    %49 = vector.broadcast %48 : vector<1x128xf32> to vector<16x128xf32>
    %50 = arith.addf %47, %49 : vector<16x128xf32>
    %51 = math.tanh %50 : vector<16x128xf32>
    %c0_33 = arith.constant 0 : index
    %c0_34 = arith.constant 0 : index
    %52 = vector.load %arg12[%c0_33, %c0_34] : memref<16x128xf32, #tpu.memory_space<vmem>>, vector<16x128xf32>
    tpu.vector_store %arg12[%c0_33, %c0_34], %51 {strides = array<i32>} : memref<16x128xf32, #tpu.memory_space<vmem>>, vector<16x128xf32>,
    return
  }
  func.func @transform_0(%arg0: i32) -> (i32, i32) {
    %c0_i32 = arith.constant 0 : i32
    %c0_i32_0 = arith.constant 0 : i32
    return %arg0, %c0_i32 : i32, i32
  }
  func.func @transform_1(%arg0: i32) -> (i32, i32) {
    %c0_i32 = arith.constant 0 : i32
    %c0_i32_0 = arith.constant 0 : i32
    %c0_i32_1 = arith.constant 0 : i32
    return %c0_i32, %c0_i32_0 : i32, i32
  }
  func.func @transform_2(%arg0: i32) -> (i32, i32) {
    %c0_i32 = arith.constant 0 : i32
    %c0_i32_0 = arith.constant 0 : i32
    %c0_i32_1 = arith.constant 0 : i32
    return %c0_i32, %c0_i32_0 : i32, i32
  }
  func.func @transform_3(%arg0: i32) -> (i32, i32) {
    %c0_i32 = arith.constant 0 : i32
    %c0_i32_0 = arith.constant 0 : i32
    %c0_i32_1 = arith.constant 0 : i32
    return %c0_i32, %c0_i32_0 : i32, i32
  }
  func.func @transform_4(%arg0: i32) -> (i32, i32) {
    %c0_i32 = arith.constant 0 : i32
    %c0_i32_0 = arith.constant 0 : i32
    %c0_i32_1 = arith.constant 0 : i32
    return %c0_i32, %c0_i32_0 : i32, i32
  }
  func.func @transform_5(%arg0: i32) -> (i32, i32) {
    %c0_i32 = arith.constant 0 : i32
    %c0_i32_0 = arith.constant 0 : i32
    %c0_i32_1 = arith.constant 0 : i32
    return %c0_i32, %c0_i32_0 : i32, i32
  }
  func.func @transform_6(%arg0: i32) -> (i32, i32) {
    %c0_i32 = arith.constant 0 : i32
    %c0_i32_0 = arith.constant 0 : i32
    %c0_i32_1 = arith.constant 0 : i32
    return %c0_i32, %c0_i32_0 : i32, i32
  }
  func.func @transform_7(%arg0: i32) -> (i32, i32) {
    %c0_i32 = arith.constant 0 : i32
    %c0_i32_0 = arith.constant 0 : i32
    %c0_i32_1 = arith.constant 0 : i32
    return %c0_i32, %c0_i32_0 : i32, i32
  }
  func.func @transform_8(%arg0: i32) -> (i32, i32) {
    %c0_i32 = arith.constant 0 : i32
    %c0_i32_0 = arith.constant 0 : i32
    %c0_i32_1 = arith.constant 0 : i32
    return %c0_i32, %c0_i32_0 : i32, i32
  }
  func.func @transform_9(%arg0: i32) -> (i32, i32) {
    %c0_i32 = arith.constant 0 : i32
    %c0_i32_0 = arith.constant 0 : i32
    %c0_i32_1 = arith.constant 0 : i32
    return %c0_i32, %c0_i32_0 : i32, i32
  }
  func.func @transform_10(%arg0: i32) -> (i32, i32) {
    %c0_i32 = arith.constant 0 : i32
    %c0_i32_0 = arith.constant 0 : i32
    %c0_i32_1 = arith.constant 0 : i32
    return %c0_i32, %c0_i32_0 : i32, i32
  }
  func.func @transform_11(%arg0: i32) -> (i32, i32) {
    %c0_i32 = arith.constant 0 : i32
    %c0_i32_0 = arith.constant 0 : i32
    return %arg0, %c0_i32 : i32, i32
  }
}

</mosaic_0001>

<bundles_post_ra>
// kernel: generator_forward.1
= control target key start
LH: loop header
LB: loop body
LE: loop exit
PB: predicated region body
PF: predicated region fallthrough
CT: control target
= control target key end

     0   :  { %16 = vsyncpa [#allocation3], 0  ;;  %s5407_s0 = inlined_call_operand.vmem [shape: f32[32,128], index: 0, kind: input, shape index: {}]   ;;  %s5408_s1 = inlined_call_operand.hbm [shape: bf16[128,128], index: 1, kind: input, shape index: {}]   ;;  %s5409_s2 = inlined_call_operand.vmem [shape: f32[1,128], index: 2, kind: input, shape index: {}]   ;;  %s5410_s3 = inlined_call_operand.hbm [shape: bf16[128,256], index: 3, kind: input, shape index: {}]   ;;  %s5411_s4 = inlined_call_operand.vmem [shape: f32[1,256], index: 4, kind: input, shape index: {}]   ;;  %s5412_s5 = inlined_call_operand.hbm [shape: bf16[256,512], index: 5, kind: input, shape index: {}]   ;;  %s5413_s6 = inlined_call_operand.vmem [shape: f32[1,512], index: 6, kind: input, shape index: {}]   ;;  %s5414_s7 = inlined_call_operand.hbm [shape: bf16[512,1024], index: 7, kind: input, shape index: {}]   ;;  %s5415_s8 = inlined_call_operand.vmem [shape: f32[1,1024], index: 8, kind: input, shape index: {}]   ;;  %s5416_s9 = inlined_call_operand.hbm [shape: bf16[1024,128], index: 9, kind: input, shape index: {}]   ;;  %s5417_s10 = inlined_call_operand.vmem [shape: f32[1,128], index: 10, kind: input, shape index: {}]   ;;  %s5418_s11 = inlined_call_operand.vmem [shape: f32[32,128], index: 11, kind: output, shape index: {}]  }
   0x1   :  { %17 = vsyncpa [#allocation5], 0 }
   0x2   :  { %18 = vsyncpa [#allocation8], 0  ;;  %s5124_s17 = smov 0  }
   0x3 LB: > { %s5048_s18 = smov [#allocation4]   ;;  %s5419_s20 = sadd.s32 4294967295, %s5046_s17   ;;  %s5046_s17 = sphi %s5124_s17, %s24_s17  }
   0x4   : > { %s319_s19 = sshll.u32 %s5048_s18, 4  ;;  %p4044_p0 = scmp.ge.s32.totalorder %s5046_s17, 1  ;;  %s5138_s19 = int_to_ptr.vmem [resolvable:$true] %s319_s19 }
   0x5   : > { %p291_p1 = scmp.lt.s32.totalorder %s5046_s17, 3  ;;  %p5134_p2 = scmp.eq.s32.totalorder %s5419_s20, 0 }
   0x6   : > { %s5049_s23 = smov [#allocation7]   ;;  %s5050_s26 = smov [#allocation2]  }
   0x7   : > { %s5425_s21 = scalar_select %p5134_p2, 1, 0 }
   0x8   : > { %p5140_p3 = pnand %p4044_p0, %p291_p1  ;;  %s351_s24 = sshll.u32 %s5049_s23, 4  ;;  %s5146_s24 = int_to_ptr.vmem [resolvable:$true] %s351_s24 }
   0x9   : > { %s5154_s27 = sshll.u32 %s5050_s26, 4  ;;  %s4888_s30 = scalar_lea.hbm %s5410_s3, 2048  ;;  %s304_s27 = int_to_ptr.vmem [resolvable:$true] %s5154_s27 }
   0xa   : > { %s5426_s22 = scalar_select %p5140_p3, 1, 0 }
   0xb   : > { %p4642_p4 = pneg %p5140_p3  ;;  %p4889_p6 = scmp.ne.s32.totalorder %s5410_s3, %s4888_s30 }
   0xc   : > { %p4895_p10 = scmp.lt.u32.totalorder %s4888_s30, %s5410_s3 }
   0xd   : > { %p5150_p5 = pnand %p5134_p2, %p4642_p4 }
   0xf   : > { %p5164_p7 = pneg %p5150_p5 }
  0x11   : > { %p4891_p8 = pnand %p5164_p7, %p4889_p6 }
  0x13   : > { %p4892_p9 = pneg %p4891_p8 }
  0x15   : > { %p4897_p11 = pnand %p4895_p10, %p4892_p9 }
  0x17   : > { %4900 = shalt.err (!%p4897_p11)
}
  0x18   : > { %s4901_s18 = scalar_lea.vmem %s5138_s19, 2048  ;;  %p4909_p1 = scmp.lt.s32.totalorder %s5138_s19, %s5138_s19 }
  0x19   : > { %p4902_p12 = scmp.ne.s32.totalorder %s5138_s19, %s4901_s18  ;;  %p4910_p4 = scmp.lt.s32.totalorder %s4901_s18, %s4901_s18 }
  0x1b   : > { %p4904_p13 = pnand %p4902_p12, %p5164_p7  ;;  %p4911_p6 = por %p4910_p4, %p4909_p1 }
  0x1d   : > { %p4905_p0 = pneg %p4904_p13 }
  0x1f   : > { %p4912_p8 = pnand %p4911_p6, %p4905_p0 }
  0x21   : > { %4915 = shalt.err (!%p4912_p8)
}
  0x22   : > { %s5051_s23 = smov 128   ;;  %s5052_s26 = smov 8  }
  0x23   : > { %4648 = dma.hbm_to_vmem [thread:$0]  (!%p5150_p5), %s5410_s3, 2048, %s5138_s19, [#allocation5], %s5051_s23, %s5051_s23, %s5052_s26  }
  0x24   : > { %s4916_s13 = scalar_lea.hbm %s5414_s7, 32768 }
  0x25   : > { %p4917_p9 = scmp.ne.s32.totalorder %s5414_s7, %s4916_s13  ;;  %p4923_p12 = scmp.lt.u32.totalorder %s4916_s13, %s5414_s7 }
  0x27   : > { %p4919_p10 = pnand %p4917_p9, %p5164_p7 }
  0x29   : > { %p4920_p11 = pneg %p4919_p10 }
  0x2b   : > { %p4925_p13 = pnand %p4923_p12, %p4920_p11 }
  0x2d   : > { %4928 = shalt.err (!%p4925_p13)
}
  0x2e   : > { %s4929_s19 = scalar_lea.vmem %s5146_s24, 32768  ;;  %p4937_p6 = scmp.lt.s32.totalorder %s5146_s24, %s5146_s24 }
  0x2f   : > { %p4930_p0 = scmp.ne.s32.totalorder %s5146_s24, %s4929_s19  ;;  %p4938_p8 = scmp.lt.s32.totalorder %s4929_s19, %s4929_s19 }
  0x31   : > { %p4932_p1 = pnand %p4930_p0, %p5164_p7  ;;  %p4939_p9 = por %p4938_p8, %p4937_p6 }
  0x33   : > { %p4933_p4 = pneg %p4932_p1 }
  0x35   : > { %p4940_p10 = pnand %p4939_p9, %p4933_p4 }
  0x37   : > { %4943 = shalt.err (!%p4940_p10)
}
  0x38   : > { %s5053_s23 = smov 512   ;;  %s5054_s20 = smov 32  }
  0x39   : > { %4654 = dma.hbm_to_vmem [thread:$0]  (!%p5150_p5), %s5414_s7, 32768, %s5146_s24, [#allocation8], %s5053_s23, %s5053_s23, %s5054_s20  }
  0x3a   : > { %s4944_s12 = scalar_lea.hbm %s5408_s1, 1024 }
  0x3b   : > { %p4945_p11 = scmp.ne.s32.totalorder %s5408_s1, %s4944_s12  ;;  %p4951_p0 = scmp.lt.u32.totalorder %s4944_s12, %s5408_s1 }
  0x3d   : > { %p4947_p12 = pnand %p4945_p11, %p5164_p7 }
  0x3f   : > { %p4948_p13 = pneg %p4947_p12 }
  0x41   : > { %p4953_p1 = pnand %p4951_p0, %p4948_p13 }
  0x43   : > { %4956 = shalt.err (!%p4953_p1)
}
  0x44   : > { %s4957_s19 = scalar_lea.vmem %s304_s27, 1024  ;;  %p4965_p9 = scmp.lt.s32.totalorder %s304_s27, %s304_s27 }
  0x45   : > { %p4958_p4 = scmp.ne.s32.totalorder %s304_s27, %s4957_s19  ;;  %p4966_p10 = scmp.lt.s32.totalorder %s4957_s19, %s4957_s19 }
  0x47   : > { %p4960_p6 = pnand %p4958_p4, %p5164_p7  ;;  %p4967_p2 = por %p4966_p10, %p4965_p9 }
  0x49   : > { %p4961_p8 = pneg %p4960_p6 }
  0x4b   : > { %p4968_p3 = pnand %p4967_p2, %p4961_p8 }
  0x4d   : > { %4971 = shalt.err (!%p4968_p3)
}
  0x4e   : > { %s5423_s24 = smov 64   ;;  %s5424_s23 = smov 4  }
  0x4f   : > { %4645 = dma.hbm_to_vmem [thread:$0]  (!%p5150_p5), %s5408_s1, 1024, %s304_s27, [#allocation3], %s5423_s24, %s5423_s24, %s5424_s23  }
  0x50   : > { %s5057_s28 = smov [#allocation6]   ;;  %s4972_s13 = scalar_lea.hbm %s5412_s5, 8192 }
  0x51   : > { %s335_s29 = sshll.u32 %s5057_s28, 4  ;;  %p4973_p2 = scmp.ne.s32.totalorder %s5412_s5, %s4972_s13  ;;  %s336_s29 = int_to_ptr.vmem [resolvable:$true] %s335_s29 }
  0x52   : > { %p4979_p12 = scmp.lt.u32.totalorder %s4972_s13, %s5412_s5 }
  0x53   : > { %p4975_p3 = pnand %p4973_p2, %p5164_p7 }
  0x55   : > { %p4976_p11 = pneg %p4975_p3 }
  0x57   : > { %p4981_p13 = pnand %p4979_p12, %p4976_p11 }
  0x59   : > { %4984 = shalt.err (!%p4981_p13)
}
  0x5a   : > { %s4985_s27 = scalar_lea.vmem %s336_s29, 8192  ;;  %p4993_p6 = scmp.lt.s32.totalorder %s336_s29, %s336_s29 }
  0x5b   : > { %p4986_p0 = scmp.ne.s32.totalorder %s336_s29, %s4985_s27  ;;  %p4994_p8 = scmp.lt.s32.totalorder %s4985_s27, %s4985_s27 }
  0x5d   : > { %p4988_p1 = pnand %p4986_p0, %p5164_p7  ;;  %p4995_p9 = por %p4994_p8, %p4993_p6 }
  0x5f   : > { %p4989_p4 = pneg %p4988_p1 }
  0x61   : > { %p4996_p10 = pnand %p4995_p9, %p4989_p4 }
  0x63   : > { %4999 = shalt.err (!%p4996_p10)
}
  0x64   : > { %s5058_s20 = smov 256   ;;  %s5059_s26 = smov 16  }
  0x65   : > { %4651 = dma.hbm_to_vmem [thread:$0]  (!%p5150_p5), %s5412_s5, 8192, %s336_s29, [#allocation5], %s5058_s20, %s5058_s20, %s5059_s26  }
  0x66   : > { %s5060_s12 = smov [#allocation9]   ;;  %s5000_s18 = scalar_lea.hbm %s5416_s9, 8192 }
  0x67   : > { %s367_s13 = sshll.u32 %s5060_s12, 4  ;;  %p5001_p2 = scmp.ne.s32.totalorder %s5416_s9, %s5000_s18  ;;  %s368_s13 = int_to_ptr.vmem [resolvable:$true] %s367_s13 }
  0x68   : > { %p5007_p12 = scmp.lt.u32.totalorder %s5000_s18, %s5416_s9 }
  0x69   : > { %p5003_p3 = pnand %p5001_p2, %p5164_p7 }
  0x6b   : > { %p5004_p11 = pneg %p5003_p3 }
  0x6d   : > { %p5009_p13 = pnand %p5007_p12, %p5004_p11 }
  0x6f   : > { %5012 = shalt.err (!%p5009_p13)
}
  0x70   : > { %s5013_s29 = scalar_lea.vmem %s368_s13, 8192  ;;  %p5021_p6 = scmp.lt.s32.totalorder %s368_s13, %s368_s13 }
  0x71   : > { %p5014_p0 = scmp.ne.s32.totalorder %s368_s13, %s5013_s29  ;;  %p5022_p8 = scmp.lt.s32.totalorder %s5013_s29, %s5013_s29 }
  0x73   : > { %p5016_p1 = pnand %p5014_p0, %p5164_p7  ;;  %p5023_p9 = por %p5022_p8, %p5021_p6 }
  0x75   : > { %p5017_p4 = pneg %p5016_p1 }
  0x77   : > { %p5024_p10 = pnand %p5023_p9, %p5017_p4 }
  0x79   : > { %5027 = shalt.err (!%p5024_p10)
}
  0x7a   : > { %s5429_s20 = smov 4   ;;  %s5430_s26 = smov 64  }
  0x7b   : > { %4657 = dma.hbm_to_vmem [thread:$0]  (!%p5150_p5), %s5416_s9, 8192, %s368_s13, [#allocation8], %s5430_s26, %s5430_s26, %s5429_s20  }
  0x7c   : > { %p5431_p2 = scmp.ne.s32.totalorder %s5426_s22, 0 }
  0x7d   : > { %p5432_p7 = scmp.ne.s32.totalorder (!%p5431_p2), %s5425_s21, 0 }
  0x7e   : > { %395 = sbr.rel (%p5431_p2) target bundleno = 1490 (0x5d2), region = 64 }
  0x85   : > { %5033 = dma.done.wait (%p5432_p7), [#allocation3], 1024  }
  0x86   : > { %5035 = vsyncadd (%p5432_p7), [#allocation3], 4294966272 }
  0x87   : > { %5037 = dma.done.wait (%p5432_p7), [#allocation5], 10240  }
  0x88   : > { %5039 = vsyncadd (%p5432_p7), [#allocation5], 4294957056 }
  0x89   : > { %5041 = dma.done.wait (%p5432_p7), [#allocation8], 40960  }
  0x8a   : > { %5043 = vsyncadd (%p5432_p7), [#allocation8], 4294926336  ;;  %v5061_v0 = vmov 0.0   ;;  %vm5062_vm0 = vmmov 0   ;;  %v4692_v1 = vld [vmem:[#allocation2] sm:$0xff]   ;;  %v4693_v2 = vld [vmem:[#allocation2 + $0x8] sm:$0xff]  }
  0x8b   : > { %4570 = vmatprep.subr.bf16.mxu0 %v5061_v0  ;;  %4586 = vmatprep.mubr.msk.bf16.mxu0 %vm5062_vm0, %v5061_v0  ;;  %v4694_v3 = vld [vmem:[#allocation2 + $0x10] sm:$0xff]   ;;  %s5433_s22 = sadd.s32 4294967295, %s5046_s17   ;;  %v4695_v4 = vld [vmem:[#allocation2 + $0x18] sm:$0xff]   ;;  %v4700_v5 = vld [vmem:[#allocation4 + $0x4] ss:$8 sps:$4 sm:$0xff]   ;;  %v5063_v28 = vmov 0  }
  0x8c   : > { %4571 = vmatpush3.bf16.msra.mxu0 %v4692_v1  ;;  %s4057_s25 = sshll.u32 %s5433_s22, 1  ;;  %v4702_v6 = vld [vmem:[#allocation4] ss:$8 sps:$4 sm:$0xff]   ;;  %v4703_v7 = vld [vmem:[#allocation4 + $0x14] ss:$8 sps:$4 sm:$0xff]   ;;  %694 = vmatprep.subr.bf16.mxu1 %v4700_v5 }
  0x8d   : > { %4572 = vmatprep.subr.bf16.mxu0 %v5061_v0  ;;  %p452_p5 = scmp.lt.s32.totalorder %s4057_s25, 3  ;;  %695 = vmatpush1.bf16.msra.mxu1 %v4702_v6  ;;  %v4705_v8 = vld [vmem:[#allocation4 + $0x10] ss:$8 sps:$4 sm:$0xff]   ;;  %v4706_v9 = vld [vmem:[#allocation4 + $0x24] ss:$8 sps:$4 sm:$0xff]  }
  0x8e   : > { %696 = vmatprep.subr.bf16.mxu1 %v4703_v7  ;;  %v4696_v10 = vld [vmem:[#allocation2 + $0x20] sm:$0xff]   ;;  %v4697_v11 = vld [vmem:[#allocation2 + $0x28] sm:$0xff]   ;;  %v4709_v13 = vld [vmem:[#allocation4 + $0x34] ss:$8 sps:$4 sm:$0xff]   ;;  %726 = vmatprep.mubr.bf16.mxu1 %v5063_v28 }
  0x8f   : > { %s5435_s25 = smov (!%p452_p5, %s4057_s25), 3  ;;  %v4708_v12 = vld [vmem:[#allocation4 + $0x20] ss:$8 sps:$4 sm:$0xff]   ;;  %v4711_v14 = vld [vmem:[#allocation4 + $0x30] ss:$8 sps:$4 sm:$0xff]  }
  0x90   : > { %4573 = vmatpush3.bf16.msra.mxu0 %v4693_v2  ;;  %s4058_s21 = sshll.u32 %s5435_s25, 3  ;;  %v4712_v15 = vld [vmem:[#allocation4 + $0x44] ss:$8 sps:$4 sm:$0xff]   ;;  %v4698_v16 = vld [vmem:[#allocation2 + $0x30] sm:$0xff]   ;;  %v4714_v17 = vld [vmem:[#allocation4 + $0x40] ss:$8 sps:$4 sm:$0xff]  }
  0x91   : > { %4574 = vmatprep.subr.bf16.mxu0 %v5061_v0  ;;  %697 = vmatpush1.bf16.msra.mxu1 %v4705_v8  ;;  %s455_s30 = scalar_lea.vmem %s5407_s0, %s4058_s21  ;;  %v4715_v18 = vld [vmem:[#allocation4 + $0x54] ss:$8 sps:$4 sm:$0xff]   ;;  %v4717_v22 = vld [vmem:[#allocation4 + $0x50] ss:$8 sps:$4 sm:$0xff]   ;;  %v4718_v24 = vld [vmem:[#allocation4 + $0x64] ss:$8 sps:$4 sm:$0xff]   ;;  %s461_s22 = scalar_lea.vmem %s5418_s11, %s4058_s21 }
  0x92   : > { %698 = vmatprep.subr.bf16.mxu1 %v4706_v9  ;;  %v4699_v19 = vld [vmem:[#allocation2 + $0x38] sm:$0xff]   ;;  %v464_v20 = vld [vmem:[%s455_s30] sm:$0xff]  ;;  %v465_v21 = vld [vmem:[%s455_s30 + $0x8] sm:$0xff] }
  0x93   : > { %v466_v23 = vpack.c.bf16 %v465_v21, %v464_v20  ;;  %v4720_v25 = vld [vmem:[#allocation4 + $0x60] ss:$8 sps:$4 sm:$0xff]   ;;  %v4721_v26 = vld [vmem:[#allocation4 + $0x74] ss:$8 sps:$4 sm:$0xff]   ;;  %v4723_v27 = vld [vmem:[#allocation4 + $0x70] ss:$8 sps:$4 sm:$0xff]  }
  0x94   : > { %4575 = vmatpush3.bf16.msra.mxu0 %v4694_v3  ;;  %v4724_v29 = vld [vmem:[#allocation6] ss:$16 sps:$4 sm:$0xff]   ;;  %v4726_v30 = vld [vmem:[#allocation6 + $0x4] ss:$16 sps:$4 sm:$0xff]   ;;  %v4729_v31 = vld [vmem:[#allocation6 + $0xc] ss:$16 sps:$4 sm:$0xff]  }
  0x95   : > { %4576 = vmatprep.subr.bf16.mxu0 %v5061_v0  ;;  %699 = vmatpush1.bf16.msra.mxu1 %v4708_v12  ;;  %v4732_v32 = vld [vmem:[#allocation6 + $0x24] ss:$16 sps:$4 sm:$0xff]   ;;  %v4730_v33 = vld [vmem:[#allocation6 + $0x20] ss:$16 sps:$4 sm:$0xff]   ;;  %v4727_v3 = vld [vmem:[#allocation6 + $0x8] ss:$16 sps:$4 sm:$0xff]  }
  0x96   : > { %700 = vmatprep.subr.bf16.mxu1 %v4709_v13  ;;  %v4738_v34 = vld [vmem:[#allocation6 + $0x44] ss:$16 sps:$4 sm:$0xff]   ;;  %v4736_v35 = vld [vmem:[#allocation6 + $0x40] ss:$16 sps:$4 sm:$0xff]   ;;  %v4735_v5 = vld [vmem:[#allocation6 + $0x2c] ss:$16 sps:$4 sm:$0xff]  }
  0x97   : > { %v4744_v36 = vld [vmem:[#allocation6 + $0x64] ss:$16 sps:$4 sm:$0xff]   ;;  %v4742_v37 = vld [vmem:[#allocation6 + $0x60] ss:$16 sps:$4 sm:$0xff]   ;;  %v4733_v6 = vld [vmem:[#allocation6 + $0x28] ss:$16 sps:$4 sm:$0xff]  }
  0x98   : > { %4577 = vmatpush3.bf16.msra.mxu0 %v4695_v4  ;;  %v4750_v38 = vld [vmem:[#allocation6 + $0x84] ss:$16 sps:$4 sm:$0xff]   ;;  %v4748_v39 = vld [vmem:[#allocation6 + $0x80] ss:$16 sps:$4 sm:$0xff]   ;;  %v4741_v7 = vld [vmem:[#allocation6 + $0x4c] ss:$16 sps:$4 sm:$0xff]  }
  0x99   : > { %4578 = vmatprep.subr.bf16.mxu0 %v5061_v0  ;;  %701 = vmatpush1.bf16.msra.mxu1 %v4711_v14  ;;  %v4756_v40 = vld [vmem:[#allocation6 + $0xa4] ss:$16 sps:$4 sm:$0xff]   ;;  %v4754_v41 = vld [vmem:[#allocation6 + $0xa0] ss:$16 sps:$4 sm:$0xff]   ;;  %v4739_v8 = vld [vmem:[#allocation6 + $0x48] ss:$16 sps:$4 sm:$0xff]  }
  0x9a   : > { %702 = vmatprep.subr.bf16.mxu1 %v4712_v15  ;;  %v4762_v42 = vld [vmem:[#allocation6 + $0xc4] ss:$16 sps:$4 sm:$0xff]   ;;  %v4760_v43 = vld [vmem:[#allocation6 + $0xc0] ss:$16 sps:$4 sm:$0xff]   ;;  %v4747_v9 = vld [vmem:[#allocation6 + $0x6c] ss:$16 sps:$4 sm:$0xff]  }
  0x9b   : > { %v4768_v44 = vld [vmem:[#allocation6 + $0xe4] ss:$16 sps:$4 sm:$0xff]   ;;  %v4766_v45 = vld [vmem:[#allocation6 + $0xe0] ss:$16 sps:$4 sm:$0xff]   ;;  %v4751_v12 = vld [vmem:[#allocation6 + $0x88] ss:$16 sps:$4 sm:$0xff]  }
  0x9c   : > { %4579 = vmatpush3.bf16.msra.mxu0 %v4696_v10  ;;  %v4774_v46 = vld [vmem:[#allocation6 + $0x104] ss:$16 sps:$4 sm:$0xff]   ;;  %v4772_v47 = vld [vmem:[#allocation6 + $0x100] ss:$16 sps:$4 sm:$0xff]   ;;  %v4745_v10 = vld [vmem:[#allocation6 + $0x68] ss:$16 sps:$4 sm:$0xff]  }
  0x9d   : > { %4580 = vmatprep.subr.bf16.mxu0 %v5061_v0  ;;  %703 = vmatpush1.bf16.msra.mxu1 %v4714_v17  ;;  %v4780_v48 = vld [vmem:[#allocation6 + $0x124] ss:$16 sps:$4 sm:$0xff]   ;;  %v4778_v49 = vld [vmem:[#allocation6 + $0x120] ss:$16 sps:$4 sm:$0xff]   ;;  %v4759_v13 = vld [vmem:[#allocation6 + $0xac] ss:$16 sps:$4 sm:$0xff]  }
  0x9e   : > { %704 = vmatprep.subr.bf16.mxu1 %v4715_v18  ;;  %v4786_v50 = vld [vmem:[#allocation6 + $0x144] ss:$16 sps:$4 sm:$0xff]   ;;  %v4784_v51 = vld [vmem:[#allocation6 + $0x140] ss:$16 sps:$4 sm:$0xff]   ;;  %v4757_v14 = vld [vmem:[#allocation6 + $0xa8] ss:$16 sps:$4 sm:$0xff]  }
  0x9f   : > { %v4792_v52 = vld [vmem:[#allocation6 + $0x164] ss:$16 sps:$4 sm:$0xff]   ;;  %v4790_v53 = vld [vmem:[#allocation6 + $0x160] ss:$16 sps:$4 sm:$0xff]   ;;  %v4765_v15 = vld [vmem:[#allocation6 + $0xcc] ss:$16 sps:$4 sm:$0xff]  }
  0xa0   : > { %4581 = vmatpush3.bf16.msra.mxu0 %v4697_v11  ;;  %v4798_v54 = vld [vmem:[#allocation6 + $0x184] ss:$16 sps:$4 sm:$0xff]   ;;  %v4796_v55 = vld [vmem:[#allocation6 + $0x180] ss:$16 sps:$4 sm:$0xff]   ;;  %v4753_v11 = vld [vmem:[#allocation6 + $0x8c] ss:$16 sps:$4 sm:$0xff]  }
  0xa1   : > { %4582 = vmatprep.subr.bf16.mxu0 %v5061_v0  ;;  %705 = vmatpush1.bf16.msra.mxu1 %v4717_v22  ;;  %v4061_v56 = vld [vmem:[%s5409_s2] ss:$0 sm:$0xff]  ;;  %v4771_v17 = vld [vmem:[#allocation6 + $0xec] ss:$16 sps:$4 sm:$0xff]   ;;  %v4769_v18 = vld [vmem:[#allocation6 + $0xe8] ss:$16 sps:$4 sm:$0xff]  }
  0xa2   : > { %706 = vmatprep.subr.bf16.mxu1 %v4718_v24  ;;  %v4775_v20 = vld [vmem:[#allocation6 + $0x108] ss:$16 sps:$4 sm:$0xff]   ;;  %v4783_v21 = vld [vmem:[#allocation6 + $0x12c] ss:$16 sps:$4 sm:$0xff]  }
  0xa3   : > { %v4781_v22 = vld [vmem:[#allocation6 + $0x128] ss:$16 sps:$4 sm:$0xff]  }
  0xa4   : > { %4583 = vmatpush3.bf16.msra.mxu0 %v4698_v16  ;;  %v4763_v16 = vld [vmem:[#allocation6 + $0xc8] ss:$16 sps:$4 sm:$0xff]  }
  0xa5   : > { %4584 = vmatprep.subr.bf16.mxu0 %v5061_v0  ;;  %707 = vmatpush1.bf16.msra.mxu1 %v4720_v25  ;;  %v4787_v24 = vld [vmem:[#allocation6 + $0x148] ss:$16 sps:$4 sm:$0xff]   ;;  %v4795_v25 = vld [vmem:[#allocation6 + $0x16c] ss:$16 sps:$4 sm:$0xff]  }
  0xa6   : > { %708 = vmatprep.subr.bf16.mxu1 %v4721_v26  ;;  %v4793_v26 = vld [vmem:[#allocation6 + $0x168] ss:$16 sps:$4 sm:$0xff]  }
  0xa7   : > { %v4799_v28 = vld [vmem:[#allocation6 + $0x188] ss:$16 sps:$4 sm:$0xff]  }
  0xa8   : > { %4585 = vmatpush3.bf16.msra.mxu0 %v4699_v19  ;;  %v4777_v19 = vld [vmem:[#allocation6 + $0x10c] ss:$16 sps:$4 sm:$0xff]  }
  0xa9   : > { %709 = vmatpush1.bf16.msra.mxu1 %v4723_v27  ;;  %1157 = vmatprep.subr.bf16.mxu0 %v4726_v30  ;;  %v4801_v27 = vld [vmem:[#allocation6 + $0x18c] ss:$16 sps:$4 sm:$0xff]  }
  0xaa   : > { %1200 = vmatprep.subr.bf16.mxu1 %v4729_v31  ;;  %v4807_v30 = vld [vmem:[#allocation6 + $0x1ac] ss:$16 sps:$4 sm:$0xff]   ;;  %v4802_v31 = vld [vmem:[#allocation6 + $0x1a0] ss:$16 sps:$4 sm:$0xff]  }
  0xab   : > { %4587 = vmatmul.mubr.bf16.vlgmr.msra.gmra.mrb[0].mxu0 %v466_v23  ;;  %v4789_v23 = vld [vmem:[#allocation6 + $0x14c] ss:$16 sps:$4 sm:$0xff]  }
  0xac   : > { %1158 = vmatpush1.bf16.msra.mxu0 %v4724_v29  ;;  %v4804_v29 = vld [vmem:[#allocation6 + $0x1a4] ss:$16 sps:$4 sm:$0xff]  }
  0xad   : > { %1159 = vmatprep.subr.bf16.mxu0 %v4732_v32  ;;  %v4805_v32 = vld [vmem:[#allocation6 + $0x1a8] ss:$16 sps:$4 sm:$0xff]  }
  0xb0   : > { %1160 = vmatpush1.bf16.msra.mxu0 %v4730_v33  ;;  %v4810_v33 = vld [vmem:[#allocation6 + $0x1c4] ss:$16 sps:$4 sm:$0xff]  }
  0xb1   : > { %1161 = vmatprep.subr.bf16.mxu0 %v4738_v34  ;;  %v4813_v34 = vld [vmem:[#allocation6 + $0x1cc] ss:$16 sps:$4 sm:$0xff]  }
  0xb4   : > { %1162 = vmatpush1.bf16.msra.mxu0 %v4736_v35  ;;  %v4808_v35 = vld [vmem:[#allocation6 + $0x1c0] ss:$16 sps:$4 sm:$0xff]  }
  0xb5   : > { %1163 = vmatprep.subr.bf16.mxu0 %v4744_v36  ;;  %v4811_v36 = vld [vmem:[#allocation6 + $0x1c8] ss:$16 sps:$4 sm:$0xff]  }
  0xb8   : > { %1164 = vmatpush1.bf16.msra.mxu0 %v4742_v37  ;;  %v4816_v37 = vld [vmem:[#allocation6 + $0x1e4] ss:$16 sps:$4 sm:$0xff]  }
  0xb9   : > { %1165 = vmatprep.subr.bf16.mxu0 %v4750_v38  ;;  %v4819_v38 = vld [vmem:[#allocation6 + $0x1ec] ss:$16 sps:$4 sm:$0xff]  }
  0xbc   : > { %1166 = vmatpush1.bf16.msra.mxu0 %v4748_v39  ;;  %v4814_v39 = vld [vmem:[#allocation6 + $0x1e0] ss:$16 sps:$4 sm:$0xff]  }
  0xbd   : > { %1167 = vmatprep.subr.bf16.mxu0 %v4756_v40  ;;  %v4817_v40 = vld [vmem:[#allocation6 + $0x1e8] ss:$16 sps:$4 sm:$0xff]  }
  0xc0   : > { %1168 = vmatpush1.bf16.msra.mxu0 %v4754_v41  ;;  %v1271_v41 = vld [vmem:[#allocation7] sm:$0xff] }
  0xc1   : > { %1169 = vmatprep.subr.bf16.mxu0 %v4762_v42  ;;  %v1275_v42 = vld [vmem:[#allocation7 + $0x20] sm:$0xff] }
  0xc4   : > { %1170 = vmatpush1.bf16.msra.mxu0 %v4760_v43  ;;  %v1272_v43 = vld [vmem:[#allocation7 + $0x8] sm:$0xff] }
  0xc5   : > { %1171 = vmatprep.subr.bf16.mxu0 %v4768_v44  ;;  %v4150_v44 = vcombine.low %v1271_v41, %v1275_v42 }
  0xc8   : > { %1172 = vmatpush1.bf16.msra.mxu0 %v4766_v45  ;;  %v4151_v45 = vcombine.high %v1271_v41, %v1275_v42  ;;  %v1315_v41 = vld [vmem:[#allocation7 + $0x160] sm:$0xff]  ;;  %v1312_v42 = vld [vmem:[#allocation7 + $0x148] sm:$0xff] }
  0xc9   : > { %1173 = vmatprep.subr.bf16.mxu0 %v4774_v46  ;;  %v1276_v46 = vld [vmem:[#allocation7 + $0x28] sm:$0xff] }
  0xcc   : > { %1174 = vmatpush1.bf16.msra.mxu0 %v4772_v47  ;;  %v4152_v47 = vcombine.low %v1272_v43, %v1276_v46 }
  0xcd   : > { %1175 = vmatprep.subr.bf16.mxu0 %v4780_v48  ;;  %v4153_v48 = vcombine.high %v1272_v43, %v1276_v46  ;;  %v1316_v43 = vld [vmem:[#allocation7 + $0x168] sm:$0xff] }
  0xd0   : > { %1176 = vmatpush1.bf16.msra.mxu0 %v4778_v49  ;;  %v604_v49 = vlaneseq }
  0xd1   : > { %1177 = vmatprep.subr.bf16.mxu0 %v4786_v50 }
  0xd2   : > { %v5296_v50 = vshrl.u32 %v604_v49, 7  ;;  %v1323_v49 = vld [vmem:[#allocation7 + $0x1a0] sm:$0xff] }
  0xd4   : > { %1178 = vmatpush1.bf16.msra.mxu0 %v4784_v51  ;;  %v5299_v51 = vsub.s32 0, %v5296_v50 }
  0xd5   : > { %1179 = vmatprep.subr.bf16.mxu0 %v4792_v52  ;;  %v602_v52 = vld [vmem:[%s5411_s4] sm:$0x3] }
  0xd8   : > { %1180 = vmatpush1.bf16.msra.mxu0 %v4790_v53  ;;  %v5305_v53 = vsub.s32 1, %v5296_v50 }
  0xd9   : > { %1181 = vmatprep.subr.bf16.mxu0 %v4798_v54  ;;  %v607_v54 = vrot.slane %v602_v52, %v5299_v51 }
  0xdc   : > { %1182 = vmatpush1.bf16.msra.mxu0 %v4796_v55  ;;  %v611_v55 = vrot.slane %v602_v52, %v5305_v53  ;;  %v1320_v52 = vld [vmem:[#allocation7 + $0x188] sm:$0xff] }
  0xdd   : > { %1183 = vmatprep.subr.bf16.mxu0 %v4804_v29 }
  0xe0   : > { %1184 = vmatpush1.bf16.msra.mxu0 %v4802_v31 }
  0xe1   : > { %1185 = vmatprep.subr.bf16.mxu0 %v4810_v33  ;;  %v1307_v33 = vld [vmem:[#allocation7 + $0x120] sm:$0xff] }
  0xe4   : > { %1186 = vmatpush1.bf16.msra.mxu0 %v4808_v35  ;;  %v1308_v35 = vld [vmem:[#allocation7 + $0x128] sm:$0xff] }
  0xe5   : > { %1187 = vmatprep.subr.bf16.mxu0 %v4816_v37 }
  0xe8   : > { %1188 = vmatpush1.bf16.msra.mxu0 %v4814_v39 }
  0xe9   : > { %2849 = vmatprep.subr.bf16.mxu0 %v4151_v45 }
 0x17e   : > { %v572_v57 = vpop.f32.mrb[0].mxu0 }
 0x17f   : > { %v573_v58 = vadd.f32 %v4061_v56, %v572_v57  ;;  %v4588_v59 = vpop.f32.mrb[1].mxu0 }
 0x180   : > { %v575_v60 = vpop.f32.mrb[2].mxu0 }
 0x181   : > { %v581_v61 = vmul.f32 0.2, %v573_v58  ;;  %v576_v62 = vadd.f32 %v4061_v56, %v575_v60  ;;  %v4589_v63 = vpop.f32.mrb[3].mxu0  ;;  %vm579_vm1 = vcmp.gt.f32.partialorder %v573_v58, 0.0 }
 0x183   : > { %vm580_vm2 = vcmp.gt.f32.partialorder %v576_v62, 0.0  ;;  %v582_v0 = vmul.f32 0.2, %v576_v62  ;;  %v583_v1 = vsel %vm579_vm1, %v573_v58, %v581_v61 }
 0x185   : > { %v584_v2 = vsel %vm580_vm2, %v576_v62, %v582_v0 }
 0x186   : > { %v585_v4 = vpack.c.bf16 %v584_v2, %v583_v1 }
 0x188   : > { %727 = vmatmul.mubr.bf16.vlgmr.msra.gmra.mrb[0].mxu1 %v585_v4  ;;  %v1279_v4 = vld [vmem:[#allocation7 + $0x40] sm:$0xff] }
 0x189   : > { %1201 = vmatpush1.bf16.msra.mxu1 %v4727_v3 }
 0x18a   : > { %1202 = vmatprep.subr.bf16.mxu1 %v4735_v5 }
 0x18d   : > { %1203 = vmatpush1.bf16.msra.mxu1 %v4733_v6 }
 0x18e   : > { %1204 = vmatprep.subr.bf16.mxu1 %v4741_v7  ;;  %v1283_v7 = vld [vmem:[#allocation7 + $0x60] sm:$0xff] }
 0x191   : > { %1205 = vmatpush1.bf16.msra.mxu1 %v4739_v8  ;;  %v1280_v8 = vld [vmem:[#allocation7 + $0x48] sm:$0xff] }
 0x192   : > { %1206 = vmatprep.subr.bf16.mxu1 %v4747_v9  ;;  %v1284_v9 = vld [vmem:[#allocation7 + $0x68] sm:$0xff] }
 0x195   : > { %1207 = vmatpush1.bf16.msra.mxu1 %v4745_v10 }
 0x196   : > { %1208 = vmatprep.subr.bf16.mxu1 %v4753_v11 }
 0x199   : > { %1209 = vmatpush1.bf16.msra.mxu1 %v4751_v12 }
 0x19a   : > { %1210 = vmatprep.subr.bf16.mxu1 %v4759_v13 }
 0x19d   : > { %1211 = vmatpush1.bf16.msra.mxu1 %v4757_v14  ;;  %v4159_v14 = vcombine.high %v1279_v4, %v1283_v7 }
 0x19e   : > { %1212 = vmatprep.subr.bf16.mxu1 %v4765_v15  ;;  %v4161_v15 = vcombine.high %v1280_v8, %v1284_v9 }
 0x1a1   : > { %1213 = vmatpush1.bf16.msra.mxu1 %v4763_v16  ;;  %v1287_v16 = vld [vmem:[#allocation7 + $0x80] sm:$0xff] }
 0x1a2   : > { %1214 = vmatprep.subr.bf16.mxu1 %v4771_v17  ;;  %v1291_v17 = vld [vmem:[#allocation7 + $0xa0] sm:$0xff] }
 0x1a5   : > { %1215 = vmatpush1.bf16.msra.mxu1 %v4769_v18  ;;  %v1288_v18 = vld [vmem:[#allocation7 + $0x88] sm:$0xff] }
 0x1a6   : > { %1216 = vmatprep.subr.bf16.mxu1 %v4777_v19  ;;  %v1292_v19 = vld [vmem:[#allocation7 + $0xa8] sm:$0xff] }
 0x1a7   : > { %v4168_v29 = vcombine.low %v1288_v18, %v1292_v19 }
 0x1a9   : > { %1217 = vmatpush1.bf16.msra.mxu1 %v4775_v20  ;;  %v4158_v20 = vcombine.low %v1279_v4, %v1283_v7  ;;  %v1339_v4 = vld [vmem:[#allocation7 + $0x220] sm:$0xff] }
 0x1aa   : > { %1218 = vmatprep.subr.bf16.mxu1 %v4783_v21  ;;  %v4160_v21 = vcombine.low %v1280_v8, %v1284_v9 }
 0x1ad   : > { %1219 = vmatpush1.bf16.msra.mxu1 %v4781_v22  ;;  %v4167_v22 = vcombine.high %v1287_v16, %v1291_v17 }
 0x1ae   : > { %1220 = vmatprep.subr.bf16.mxu1 %v4789_v23  ;;  %v4169_v23 = vcombine.high %v1288_v18, %v1292_v19  ;;  %v1351_v19 = vld [vmem:[#allocation7 + $0x280] sm:$0xff] }
 0x1b1   : > { %1221 = vmatpush1.bf16.msra.mxu1 %v4787_v24  ;;  %v1295_v24 = vld [vmem:[#allocation7 + $0xc0] sm:$0xff] }
 0x1b2   : > { %1222 = vmatprep.subr.bf16.mxu1 %v4795_v25  ;;  %v1299_v25 = vld [vmem:[#allocation7 + $0xe0] sm:$0xff] }
 0x1b5   : > { %1223 = vmatpush1.bf16.msra.mxu1 %v4793_v26  ;;  %v1296_v26 = vld [vmem:[#allocation7 + $0xc8] sm:$0xff] }
 0x1b6   : > { %1224 = vmatprep.subr.bf16.mxu1 %v4801_v27  ;;  %v1300_v27 = vld [vmem:[#allocation7 + $0xe8] sm:$0xff] }
 0x1b7   : > { %v4177_v31 = vcombine.high %v1296_v26, %v1300_v27  ;;  %v4176_v37 = vcombine.low %v1296_v26, %v1300_v27  ;;  %v1359_v27 = vld [vmem:[#allocation7 + $0x2c0] sm:$0xff] }
 0x1b9   : > { %1225 = vmatpush1.bf16.msra.mxu1 %v4799_v28  ;;  %v4166_v28 = vcombine.low %v1287_v16, %v1291_v17 }
 0x1ba   : > { %1226 = vmatprep.subr.bf16.mxu1 %v4807_v30  ;;  %v4175_v30 = vcombine.high %v1295_v24, %v1299_v25 }
 0x1bd   : > { %1227 = vmatpush1.bf16.msra.mxu1 %v4805_v32  ;;  %v1303_v32 = vld [vmem:[#allocation7 + $0x100] sm:$0xff] }
 0x1be   : > { %1228 = vmatprep.subr.bf16.mxu1 %v4813_v34  ;;  %v1304_v34 = vld [vmem:[#allocation7 + $0x108] sm:$0xff] }
 0x1bf   : > { %v4185_v39 = vcombine.high %v1304_v34, %v1308_v35  ;;  %v4184_v45 = vcombine.low %v1304_v34, %v1308_v35  ;;  %v1367_v35 = vld [vmem:[#allocation7 + $0x300] sm:$0xff] }
 0x1c1   : > { %1229 = vmatpush1.bf16.msra.mxu1 %v4811_v36  ;;  %v4174_v36 = vcombine.low %v1295_v24, %v1299_v25 }
 0x1c2   : > { %1230 = vmatprep.subr.bf16.mxu1 %v4819_v38  ;;  %v4183_v38 = vcombine.high %v1303_v32, %v1307_v33 }
 0x1c5   : > { %1231 = vmatpush1.bf16.msra.mxu1 %v4817_v40  ;;  %v1311_v40 = vld [vmem:[#allocation7 + $0x140] sm:$0xff] }
 0x1c6   : > { %2935 = vmatprep.subr.bf16.mxu1 %v4153_v48  ;;  %v4191_v46 = vcombine.high %v1311_v40, %v1315_v41  ;;  %v1319_v48 = vld [vmem:[#allocation7 + $0x180] sm:$0xff] }
 0x25b   : > { %v728_v56 = vpop.f32.mrb[0].mxu1 }
 0x25c   : > { %v729_v57 = vadd.f32 %v728_v56, %v607_v54  ;;  %v730_v58 = vpop.f32.mrb[1].mxu1  ;;  %v4192_v56 = vcombine.low %v1312_v42, %v1316_v43 }
 0x25d   : > { %v731_v59 = vadd.f32 %v730_v58, %v611_v55  ;;  %v732_v60 = vpop.f32.mrb[2].mxu1 }
 0x25e   : > { %v741_v61 = vmul.f32 0.2, %v729_v57  ;;  %v733_v62 = vadd.f32 %v732_v60, %v607_v54  ;;  %v734_v63 = vpop.f32.mrb[3].mxu1  ;;  %vm737_vm3 = vcmp.gt.f32.partialorder %v729_v57, 0.0  ;;  %v1324_v54 = vld [vmem:[#allocation7 + $0x1a8] sm:$0xff]  ;;  %v1331_v60 = vld [vmem:[#allocation7 + $0x1e0] sm:$0xff] }
 0x25f   : > { %v742_v0 = vmul.f32 0.2, %v731_v59  ;;  %v735_v1 = vadd.f32 %v734_v63, %v611_v55  ;;  %vm738_vm4 = vcmp.gt.f32.partialorder %v731_v59, 0.0  ;;  %v4190_v55 = vcombine.low %v1311_v40, %v1315_v41 }
 0x260   : > { %vm739_vm5 = vcmp.gt.f32.partialorder %v733_v62, 0.0  ;;  %v743_v2 = vmul.f32 0.2, %v733_v62  ;;  %v745_v5 = vsel %vm737_vm3, %v729_v57, %v741_v61  ;;  %v4199_v57 = vcombine.high %v1319_v48, %v1323_v49  ;;  %v1328_v61 = vld [vmem:[#allocation7 + $0x1c8] sm:$0xff] }
 0x261   : > { %vm740_vm6 = vcmp.gt.f32.partialorder %v735_v1, 0.0  ;;  %v744_v3 = vmul.f32 0.2, %v735_v1  ;;  %v746_v11 = vsel %vm738_vm4, %v731_v59, %v742_v0  ;;  %v4201_v58 = vcombine.high %v1320_v52, %v1324_v54  ;;  %v1327_v59 = vld [vmem:[#allocation7 + $0x1c0] sm:$0xff] }
 0x262   : > { %v747_v6 = vsel %vm739_vm5, %v733_v62, %v743_v2  ;;  %v1332_v62 = vld [vmem:[#allocation7 + $0x1e8] sm:$0xff]  ;;  %v4198_v63 = vcombine.low %v1319_v48, %v1323_v49  ;;  %v4200_v0 = vcombine.low %v1320_v52, %v1324_v54  ;;  %v4206_v7 = vcombine.low %v1327_v59, %v1331_v60 }
 0x263   : > { %v749_v10 = vpack.c.bf16 %v747_v6, %v745_v5  ;;  %v748_v12 = vsel %vm740_vm6, %v735_v1, %v744_v3  ;;  %v4207_v1 = vcombine.high %v1327_v59, %v1331_v60  ;;  %v4209_v2 = vcombine.high %v1328_v61, %v1332_v62  ;;  %v1335_v3 = vld [vmem:[#allocation7 + $0x200] sm:$0xff]  ;;  %v1336_v5 = vld [vmem:[#allocation7 + $0x208] sm:$0xff] }
 0x264   : > { %v750_v13 = vpack.c.bf16 %v748_v12, %v746_v11  ;;  %v1340_v6 = vld [vmem:[#allocation7 + $0x228] sm:$0xff]  ;;  %v4208_v8 = vcombine.low %v1328_v61, %v1332_v62  ;;  %v4215_v9 = vcombine.high %v1335_v3, %v1339_v4  ;;  %v1343_v11 = vld [vmem:[#allocation7 + $0x240] sm:$0xff] }
 0x265   : > { %v1347_v12 = vld [vmem:[#allocation7 + $0x260] sm:$0xff]  ;;  %v4216_v16 = vcombine.low %v1336_v5, %v1340_v6  ;;  %v1388_v60 = vld [vmem:[#allocation7 + $0x3a8] sm:$0xff] }
 0x266   : > { %1189 = vmatprep.mubr.bf16.mxu0 %v750_v13  ;;  %1232 = vmatprep.mubr.bf16.mxu1 %v750_v13  ;;  %v1344_v13 = vld [vmem:[#allocation7 + $0x248] sm:$0xff]  ;;  %v4223_v17 = vcombine.high %v1343_v11, %v1347_v12 }
 0x267   : > { %1190 = vmatmul.mubr.bf16.vlgmr.msra.gmra.mrb[4].mxu0 %v749_v10  ;;  %1233 = vmatmul.mubr.bf16.vlgmr.msra.gmra.mrb[4].mxu1 %v749_v10  ;;  %v4217_v10 = vcombine.high %v1336_v5, %v1340_v6 }
 0x268   : > { %2850 = vmatpush1.bf16.msra.mxu0 %v4150_v44  ;;  %2936 = vmatpush1.bf16.msra.mxu1 %v4152_v47  ;;  %v4182_v44 = vcombine.low %v1303_v32, %v1307_v33  ;;  %v4193_v47 = vcombine.high %v1312_v42, %v1316_v43  ;;  %v1375_v43 = vld [vmem:[#allocation7 + $0x340] sm:$0xff] }
 0x269   : > { %2851 = vmatprep.subr.bf16.mxu0 %v4159_v14  ;;  %2937 = vmatprep.subr.bf16.mxu1 %v4161_v15  ;;  %v1348_v14 = vld [vmem:[#allocation7 + $0x268] sm:$0xff]  ;;  %v4214_v15 = vcombine.low %v1335_v3, %v1339_v4 }
 0x26a   : > { %v4225_v18 = vcombine.high %v1344_v13, %v1348_v14  ;;  %v4224_v24 = vcombine.low %v1344_v13, %v1348_v14  ;;  %v1396_v4 = vld [vmem:[#allocation7 + $0x3e8] sm:$0xff] }
 0x26c   : > { %2852 = vmatpush1.bf16.msra.mxu0 %v4158_v20  ;;  %2938 = vmatpush1.bf16.msra.mxu1 %v4160_v21  ;;  %v1355_v20 = vld [vmem:[#allocation7 + $0x2a0] sm:$0xff]  ;;  %v1352_v21 = vld [vmem:[#allocation7 + $0x288] sm:$0xff] }
 0x26d   : > { %2853 = vmatprep.subr.bf16.mxu0 %v4167_v22  ;;  %2939 = vmatprep.subr.bf16.mxu1 %v4169_v23  ;;  %v1356_v22 = vld [vmem:[#allocation7 + $0x2a8] sm:$0xff]  ;;  %v4222_v23 = vcombine.low %v1343_v11, %v1347_v12  ;;  %v4231_v25 = vcombine.high %v1351_v19, %v1355_v20 }
 0x26e   : > { %v4233_v26 = vcombine.high %v1352_v21, %v1356_v22  ;;  %v4232_v32 = vcombine.low %v1352_v21, %v1356_v22  ;;  %v5317_v12 = vld [vmem:[#allocation7 + $0x428] sm:$0xff] }
 0x270   : > { %2854 = vmatpush1.bf16.msra.mxu0 %v4166_v28  ;;  %2940 = vmatpush1.bf16.msra.mxu1 %v4168_v29  ;;  %v1363_v28 = vld [vmem:[#allocation7 + $0x2e0] sm:$0xff]  ;;  %v1360_v29 = vld [vmem:[#allocation7 + $0x2c8] sm:$0xff] }
 0x271   : > { %2855 = vmatprep.subr.bf16.mxu0 %v4175_v30  ;;  %2941 = vmatprep.subr.bf16.mxu1 %v4177_v31  ;;  %v1364_v30 = vld [vmem:[#allocation7 + $0x2e8] sm:$0xff]  ;;  %v4230_v31 = vcombine.low %v1351_v19, %v1355_v20  ;;  %v4239_v33 = vcombine.high %v1359_v27, %v1363_v28 }
 0x272   : > { %v4241_v34 = vcombine.high %v1360_v29, %v1364_v30  ;;  %v4240_v40 = vcombine.low %v1360_v29, %v1364_v30 }
 0x274   : > { %2856 = vmatpush1.bf16.msra.mxu0 %v4174_v36  ;;  %2942 = vmatpush1.bf16.msra.mxu1 %v4176_v37  ;;  %v1371_v36 = vld [vmem:[#allocation7 + $0x320] sm:$0xff]  ;;  %v1368_v37 = vld [vmem:[#allocation7 + $0x308] sm:$0xff] }
 0x275   : > { %2857 = vmatprep.subr.bf16.mxu0 %v4183_v38  ;;  %2943 = vmatprep.subr.bf16.mxu1 %v4185_v39  ;;  %v1372_v38 = vld [vmem:[#allocation7 + $0x328] sm:$0xff]  ;;  %v4238_v39 = vcombine.low %v1359_v27, %v1363_v28  ;;  %v4247_v41 = vcombine.high %v1367_v35, %v1371_v36 }
 0x276   : > { %v4249_v42 = vcombine.high %v1368_v37, %v1372_v38  ;;  %v4248_v48 = vcombine.low %v1368_v37, %v1372_v38 }
 0x278   : > { %2858 = vmatpush1.bf16.msra.mxu0 %v4182_v44  ;;  %2944 = vmatpush1.bf16.msra.mxu1 %v4184_v45  ;;  %v1379_v44 = vld [vmem:[#allocation7 + $0x360] sm:$0xff]  ;;  %v1376_v45 = vld [vmem:[#allocation7 + $0x348] sm:$0xff] }
 0x279   : > { %2859 = vmatprep.subr.bf16.mxu0 %v4191_v46  ;;  %2945 = vmatprep.subr.bf16.mxu1 %v4193_v47  ;;  %v1380_v46 = vld [vmem:[#allocation7 + $0x368] sm:$0xff]  ;;  %v4246_v47 = vcombine.low %v1367_v35, %v1371_v36  ;;  %v4255_v49 = vcombine.high %v1375_v43, %v1379_v44  ;;  %v4254_v54 = vcombine.low %v1375_v43, %v1379_v44 }
 0x27a   : > { %v4257_v52 = vcombine.high %v1376_v45, %v1380_v46 }
 0x27c   : > { %2860 = vmatpush1.bf16.msra.mxu0 %v4190_v55  ;;  %2946 = vmatpush1.bf16.msra.mxu1 %v4192_v56  ;;  %v4256_v55 = vcombine.low %v1376_v45, %v1380_v46  ;;  %v1383_v56 = vld [vmem:[#allocation7 + $0x380] sm:$0xff] }
 0x27d   : > { %2861 = vmatprep.subr.bf16.mxu0 %v4199_v57  ;;  %2947 = vmatprep.subr.bf16.mxu1 %v4201_v58  ;;  %v1387_v57 = vld [vmem:[#allocation7 + $0x3a0] sm:$0xff]  ;;  %v1384_v58 = vld [vmem:[#allocation7 + $0x388] sm:$0xff] }
 0x27e   : > { %v4263_v59 = vcombine.high %v1383_v56, %v1387_v57  ;;  %v4262_v61 = vcombine.low %v1383_v56, %v1387_v57  ;;  %v4264_v62 = vcombine.low %v1384_v58, %v1388_v60  ;;  %v1407_v56 = vld [vmem:[#allocation7 + $0x440] sm:$0xff] }
 0x280   : > { %2862 = vmatpush1.bf16.msra.mxu0 %v4198_v63  ;;  %2948 = vmatpush1.bf16.msra.mxu1 %v4200_v0  ;;  %v4265_v63 = vcombine.high %v1384_v58, %v1388_v60  ;;  %v1391_v0 = vld [vmem:[#allocation7 + $0x3c0] sm:$0xff] }
 0x281   : > { %2863 = vmatprep.subr.bf16.mxu0 %v4207_v1  ;;  %2949 = vmatprep.subr.bf16.mxu1 %v4209_v2  ;;  %v1395_v1 = vld [vmem:[#allocation7 + $0x3e0] sm:$0xff]  ;;  %v1392_v2 = vld [vmem:[#allocation7 + $0x3c8] sm:$0xff] }
 0x282   : > { %v4271_v3 = vcombine.high %v1391_v0, %v1395_v1  ;;  %v4270_v5 = vcombine.low %v1391_v0, %v1395_v1  ;;  %v4272_v6 = vcombine.low %v1392_v2, %v1396_v4 }
 0x284   : > { %2864 = vmatpush1.bf16.msra.mxu0 %v4206_v7  ;;  %2950 = vmatpush1.bf16.msra.mxu1 %v4208_v8  ;;  %v4273_v7 = vcombine.high %v1392_v2, %v1396_v4  ;;  %v5309_v8 = vld [vmem:[#allocation7 + $0x400] sm:$0xff] }
 0x285   : > { %2865 = vmatprep.subr.bf16.mxu0 %v4215_v9  ;;  %2951 = vmatprep.subr.bf16.mxu1 %v4217_v10  ;;  %v5311_v9 = vld [vmem:[#allocation7 + $0x420] sm:$0xff]  ;;  %v5313_v10 = vld [vmem:[#allocation7 + $0x408] sm:$0xff] }
 0x286   : > { %v4279_v11 = vcombine.high %v5309_v8, %v5311_v9  ;;  %v4278_v13 = vcombine.low %v5309_v8, %v5311_v9  ;;  %v4280_v14 = vcombine.low %v5313_v10, %v5317_v12  ;;  %v1415_v2 = vld [vmem:[#allocation7 + $0x480] sm:$0xff] }
 0x288   : > { %2866 = vmatpush1.bf16.msra.mxu0 %v4214_v15  ;;  %2952 = vmatpush1.bf16.msra.mxu1 %v4216_v16  ;;  %v4281_v15 = vcombine.high %v5313_v10, %v5317_v12  ;;  %v827_v16 = vsub.s32 2, %v5296_v50 }
 0x289   : > { %2867 = vmatprep.subr.bf16.mxu0 %v4223_v17  ;;  %2953 = vmatprep.subr.bf16.mxu1 %v4225_v18  ;;  %v815_v17 = vld [vmem:[%s5413_s6] sm:$0xf]  ;;  %v831_v18 = vsub.s32 3, %v5296_v50 }
 0x28a   : > { %v820_v19 = vrot.slane %v815_v17, %v5299_v51  ;;  %v828_v20 = vrot.slane %v815_v17, %v827_v16  ;;  %v824_v21 = vrot.slane %v815_v17, %v5305_v53 }
 0x28b   : > { %v832_v22 = vrot.slane %v815_v17, %v831_v18 }
 0x28c   : > { %2868 = vmatpush1.bf16.msra.mxu0 %v4222_v23  ;;  %2954 = vmatpush1.bf16.msra.mxu1 %v4224_v24 }
 0x28d   : > { %2869 = vmatprep.subr.bf16.mxu0 %v4231_v25  ;;  %2955 = vmatprep.subr.bf16.mxu1 %v4233_v26 }
 0x290   : > { %2870 = vmatpush1.bf16.msra.mxu0 %v4230_v31  ;;  %2956 = vmatpush1.bf16.msra.mxu1 %v4232_v32 }
 0x291   : > { %2871 = vmatprep.subr.bf16.mxu0 %v4239_v33  ;;  %2957 = vmatprep.subr.bf16.mxu1 %v4241_v34 }
 0x294   : > { %2872 = vmatpush1.bf16.msra.mxu0 %v4238_v39  ;;  %2958 = vmatpush1.bf16.msra.mxu1 %v4240_v40 }
 0x295   : > { %2873 = vmatprep.subr.bf16.mxu0 %v4247_v41  ;;  %2959 = vmatprep.subr.bf16.mxu1 %v4249_v42 }
 0x298   : > { %2874 = vmatpush1.bf16.msra.mxu0 %v4246_v47  ;;  %2960 = vmatpush1.bf16.msra.mxu1 %v4248_v48 }
 0x299   : > { %2875 = vmatprep.subr.bf16.mxu0 %v4255_v49  ;;  %2961 = vmatprep.subr.bf16.mxu1 %v4257_v52 }
 0x29c   : > { %2876 = vmatpush1.bf16.msra.mxu0 %v4254_v54  ;;  %2962 = vmatpush1.bf16.msra.mxu1 %v4256_v55 }
 0x29d   : > { %2877 = vmatprep.subr.bf16.mxu0 %v4263_v59  ;;  %2963 = vmatprep.subr.bf16.mxu1 %v4265_v63  ;;  %v1412_v63 = vld [vmem:[#allocation7 + $0x468] sm:$0xff] }
 0x2a0   : > { %2878 = vmatpush1.bf16.msra.mxu0 %v4262_v61  ;;  %2964 = vmatpush1.bf16.msra.mxu1 %v4264_v62  ;;  %v1411_v61 = vld [vmem:[#allocation7 + $0x460] sm:$0xff]  ;;  %v1408_v62 = vld [vmem:[#allocation7 + $0x448] sm:$0xff] }
 0x2a1   : > { %2879 = vmatprep.subr.bf16.mxu0 %v4271_v3  ;;  %2965 = vmatprep.subr.bf16.mxu1 %v4273_v7  ;;  %v4287_v3 = vcombine.high %v1407_v56, %v1411_v61  ;;  %v4289_v4 = vcombine.high %v1408_v62, %v1412_v63  ;;  %v1420_v7 = vld [vmem:[#allocation7 + $0x4a8] sm:$0xff] }
 0x2a4   : > { %2880 = vmatpush1.bf16.msra.mxu0 %v4270_v5  ;;  %2966 = vmatpush1.bf16.msra.mxu1 %v4272_v6  ;;  %v1419_v5 = vld [vmem:[#allocation7 + $0x4a0] sm:$0xff]  ;;  %v1416_v6 = vld [vmem:[#allocation7 + $0x488] sm:$0xff] }
 0x2a5   : > { %2892 = vmatprep.subr.bf16.mxu0 %v4279_v11  ;;  %2978 = vmatprep.subr.bf16.mxu1 %v4281_v15  ;;  %v4286_v11 = vcombine.low %v1407_v56, %v1411_v61  ;;  %v4288_v15 = vcombine.low %v1408_v62, %v1412_v63  ;;  %v4295_v17 = vcombine.high %v1415_v2, %v1419_v5  ;;  %v1464_v61 = vld [vmem:[#allocation7 + $0x608] sm:$0xff] }
 0x2a6   : > { %v4294_v8 = vcombine.low %v1415_v2, %v1419_v5  ;;  %v4296_v9 = vcombine.low %v1416_v6, %v1420_v7  ;;  %v1468_v62 = vld [vmem:[#allocation7 + $0x628] sm:$0xff]  ;;  %v1471_v5 = vld [vmem:[#allocation7 + $0x640] sm:$0xff] }
 0x33a   : > { %v1191_v23 = vpop.f32.mrb[4].mxu0  ;;  %v1234_v24 = vpop.f32.mrb[4].mxu1 }
 0x33b   : > { %v1192_v25 = vadd.f32 %v1191_v23, %v820_v19  ;;  %v1235_v26 = vadd.f32 %v1234_v24, %v828_v20  ;;  %v1193_v27 = vpop.f32.mrb[5].mxu0  ;;  %v1236_v28 = vpop.f32.mrb[5].mxu1  ;;  %v1428_v23 = vld [vmem:[#allocation7 + $0x4e8] sm:$0xff] }
 0x33c   : > { %v1194_v29 = vadd.f32 %v1193_v27, %v824_v21  ;;  %v1237_v30 = vadd.f32 %v1236_v28, %v832_v22  ;;  %v1195_v31 = vpop.f32.mrb[6].mxu0  ;;  %v1238_v32 = vpop.f32.mrb[6].mxu1  ;;  %v1432_v24 = vld [vmem:[#allocation7 + $0x508] sm:$0xff] }
 0x33d   : > { %vm1243_vm7 = vcmp.gt.f32.partialorder %v1192_v25, 0.0  ;;  %v1251_v33 = vmul.f32 0.2, %v1192_v25  ;;  %vm1245_vm8 = vcmp.gt.f32.partialorder %v1235_v26, 0.0  ;;  %v1253_v34 = vmul.f32 0.2, %v1235_v26 }
 0x33e   : > { %vm1244_vm9 = vcmp.gt.f32.partialorder %v1194_v29, 0.0  ;;  %v1252_v35 = vmul.f32 0.2, %v1194_v29  ;;  %vm1246_vm10 = vcmp.gt.f32.partialorder %v1237_v30, 0.0  ;;  %v1254_v36 = vmul.f32 0.2, %v1237_v30 }
 0x33f   : > { %v1196_v37 = vadd.f32 %v1195_v31, %v820_v19  ;;  %v1239_v38 = vadd.f32 %v1238_v32, %v828_v20  ;;  %v1197_v39 = vpop.f32.mrb[7].mxu0  ;;  %v1240_v40 = vpop.f32.mrb[7].mxu1  ;;  %v1259_v41 = vsel %vm1243_vm7, %v1192_v25, %v1251_v33  ;;  %v1261_v42 = vsel %vm1245_vm8, %v1235_v26, %v1253_v34  ;;  %v1423_v20 = vld [vmem:[#allocation7 + $0x4c0] sm:$0xff]  ;;  %v1436_v25 = vld [vmem:[#allocation7 + $0x528] sm:$0xff] }
 0x340   : > { %v1198_v43 = vadd.f32 %v1197_v39, %v824_v21  ;;  %v1241_v44 = vadd.f32 %v1240_v40, %v832_v22  ;;  %v1260_v49 = vsel %vm1244_vm9, %v1194_v29, %v1252_v35  ;;  %v1262_v52 = vsel %vm1246_vm10, %v1237_v30, %v1254_v36  ;;  %v1427_v21 = vld [vmem:[#allocation7 + $0x4e0] sm:$0xff]  ;;  %v1424_v22 = vld [vmem:[#allocation7 + $0x4c8] sm:$0xff] }
 0x341   : > { %vm1247_vm11 = vcmp.gt.f32.partialorder %v1196_v37, 0.0  ;;  %v1255_v45 = vmul.f32 0.2, %v1196_v37  ;;  %vm1249_vm12 = vcmp.gt.f32.partialorder %v1239_v38, 0.0  ;;  %v1257_v46 = vmul.f32 0.2, %v1239_v38 }
 0x342   : > { %vm1248_vm13 = vcmp.gt.f32.partialorder %v1198_v43, 0.0  ;;  %v1256_v47 = vmul.f32 0.2, %v1198_v43  ;;  %vm1250_vm14 = vcmp.gt.f32.partialorder %v1241_v44, 0.0  ;;  %v1258_v48 = vmul.f32 0.2, %v1241_v44 }
 0x343   : > { %v1263_v54 = vsel %vm1247_vm11, %v1196_v37, %v1255_v45  ;;  %v1265_v55 = vsel %vm1249_vm12, %v1239_v38, %v1257_v46  ;;  %v4297_v19 = vcombine.high %v1416_v6, %v1420_v7  ;;  %v4303_v10 = vcombine.high %v1423_v20, %v1427_v21  ;;  %v1439_v30 = vld [vmem:[#allocation7 + $0x540] sm:$0xff]  ;;  %v1440_v32 = vld [vmem:[#allocation7 + $0x548] sm:$0xff] }
 0x344   : > { %v5338_v57 = vpack.c.bf16 %v1263_v54, %v1259_v41  ;;  %v5340_v58 = vpack.c.bf16 %v1265_v55, %v1261_v42  ;;  %v1264_v59 = vsel %vm1248_vm13, %v1198_v43, %v1256_v47  ;;  %v1266_v60 = vsel %vm1250_vm14, %v1241_v44, %v1258_v48  ;;  %v1443_v31 = vld [vmem:[#allocation7 + $0x560] sm:$0xff]  ;;  %v1444_v33 = vld [vmem:[#allocation7 + $0x568] sm:$0xff] }
 0x345   : > { %v5342_v0 = vpack.c.bf16 %v1264_v59, %v1260_v49  ;;  %v5344_v1 = vpack.c.bf16 %v1266_v60, %v1262_v52  ;;  %v4305_v12 = vcombine.high %v1424_v22, %v1428_v23  ;;  %v4302_v26 = vcombine.low %v1423_v20, %v1427_v21  ;;  %v1447_v38 = vld [vmem:[#allocation7 + $0x580] sm:$0xff]  ;;  %v1448_v40 = vld [vmem:[#allocation7 + $0x588] sm:$0xff] }
 0x346   : > { %v4304_v27 = vcombine.low %v1424_v22, %v1428_v23  ;;  %v4313_v29 = vcombine.high %v1432_v24, %v1436_v25  ;;  %v4312_v35 = vcombine.low %v1432_v24, %v1436_v25  ;;  %v4319_v36 = vcombine.high %v1439_v30, %v1443_v31  ;;  %v1451_v39 = vld [vmem:[#allocation7 + $0x5a0] sm:$0xff]  ;;  %v1452_v41 = vld [vmem:[#allocation7 + $0x5a8] sm:$0xff] }
 0x347   : > { %2881 = vmatprep.mubr.bf16.mxu0 %v5342_v0  ;;  %2967 = vmatprep.mubr.bf16.mxu1 %v5342_v0  ;;  %v4321_v37 = vcombine.high %v1440_v32, %v1444_v33  ;;  %v4318_v42 = vcombine.low %v1439_v30, %v1443_v31  ;;  %v4320_v43 = vcombine.low %v1440_v32, %v1444_v33  ;;  %v1455_v46 = vld [vmem:[#allocation7 + $0x5c0] sm:$0xff]  ;;  %v1456_v48 = vld [vmem:[#allocation7 + $0x5c8] sm:$0xff] }
 0x348   : > { %2882 = vmatmul.mubr.bf16.vlgmr.msra.gmra.mrb[8].mxu0 %v5338_v57  ;;  %2968 = vmatmul.mubr.bf16.vlgmr.msra.gmra.mrb[8].mxu1 %v5338_v57  ;;  %v4327_v44 = vcombine.high %v1447_v38, %v1451_v39  ;;  %v4329_v45 = vcombine.high %v1448_v40, %v1452_v41  ;;  %v1459_v47 = vld [vmem:[#allocation7 + $0x5e0] sm:$0xff]  ;;  %v1460_v49 = vld [vmem:[#allocation7 + $0x5e8] sm:$0xff]  ;;  %v4326_v52 = vcombine.low %v1447_v38, %v1451_v39 }
 0x349   : > { %2893 = vmatpush1.bf16.msra.mxu0 %v4278_v13  ;;  %2979 = vmatpush1.bf16.msra.mxu1 %v4280_v14  ;;  %v1431_v13 = vld [vmem:[#allocation7 + $0x500] sm:$0xff]  ;;  %v4328_v54 = vcombine.low %v1448_v40, %v1452_v41  ;;  %v4335_v55 = vcombine.high %v1455_v46, %v1459_v47  ;;  %v4337_v56 = vcombine.high %v1456_v48, %v1460_v49  ;;  %v1472_v7 = vld [vmem:[#allocation7 + $0x648] sm:$0xff] }
 0x34a   : > { %2924 = vmatprep.mubr.bf16.mxu0 %v5344_v1  ;;  %3010 = vmatprep.mubr.bf16.mxu1 %v5344_v1  ;;  %v1435_v14 = vld [vmem:[#allocation7 + $0x520] sm:$0xff]  ;;  %v4334_v63 = vcombine.low %v1455_v46, %v1459_v47  ;;  %v4336_v2 = vcombine.low %v1456_v48, %v1460_v49  ;;  %v1480_v23 = vld [vmem:[#allocation7 + $0x688] sm:$0xff] }
 0x34b   : > { %2894 = vmatprep.subr.bf16.mxu0 %v4287_v3  ;;  %2980 = vmatprep.subr.bf16.mxu1 %v4289_v4  ;;  %v4311_v28 = vcombine.high %v1431_v13, %v1435_v14  ;;  %v4310_v34 = vcombine.low %v1431_v13, %v1435_v14  ;;  %v1463_v59 = vld [vmem:[#allocation7 + $0x600] sm:$0xff]  ;;  %v4345_v4 = vcombine.high %v1464_v61, %v1468_v62  ;;  %v1488_v25 = vld [vmem:[#allocation7 + $0x6c8] sm:$0xff] }
 0x34c   : > { %v1467_v60 = vld [vmem:[#allocation7 + $0x620] sm:$0xff]  ;;  %v1496_v33 = vld [vmem:[#allocation7 + $0x708] sm:$0xff] }
 0x34d   : > { %2895 = vmatpush1.bf16.msra.mxu0 %v4286_v11  ;;  %2981 = vmatpush1.bf16.msra.mxu1 %v4288_v15  ;;  %v4343_v3 = vcombine.high %v1463_v59, %v1467_v60  ;;  %v1475_v6 = vld [vmem:[#allocation7 + $0x660] sm:$0xff]  ;;  %v1476_v11 = vld [vmem:[#allocation7 + $0x668] sm:$0xff]  ;;  %v4342_v15 = vcombine.low %v1463_v59, %v1467_v60 }
 0x34e   : > { %2896 = vmatprep.subr.bf16.mxu0 %v4295_v17  ;;  %2982 = vmatprep.subr.bf16.mxu1 %v4297_v19  ;;  %v4344_v17 = vcombine.low %v1464_v61, %v1468_v62  ;;  %v4351_v19 = vcombine.high %v1471_v5, %v1475_v6  ;;  %v4353_v20 = vcombine.high %v1472_v7, %v1476_v11  ;;  %v1479_v21 = vld [vmem:[#allocation7 + $0x680] sm:$0xff]  ;;  %v1504_v41 = vld [vmem:[#allocation7 + $0x748] sm:$0xff] }
 0x34f   : > { %v1483_v22 = vld [vmem:[#allocation7 + $0x6a0] sm:$0xff]  ;;  %v1512_v49 = vld [vmem:[#allocation7 + $0x788] sm:$0xff] }
 0x350   : > { %v1487_v14 = vld [vmem:[#allocation7 + $0x6c0] sm:$0xff]  ;;  %v1520_v62 = vld [vmem:[#allocation7 + $0x7c8] sm:$0xff] }
 0x351   : > { %2897 = vmatpush1.bf16.msra.mxu0 %v4294_v8  ;;  %2983 = vmatpush1.bf16.msra.mxu1 %v4296_v9  ;;  %v1484_v8 = vld [vmem:[#allocation7 + $0x6a8] sm:$0xff]  ;;  %v4350_v9 = vcombine.low %v1471_v5, %v1475_v6  ;;  %v1491_v24 = vld [vmem:[#allocation7 + $0x6e0] sm:$0xff]  ;;  %v1273_v6 = vld [vmem:[#allocation7 + $0x10] sm:$0xff] }
 0x352   : > { %2898 = vmatprep.subr.bf16.mxu0 %v4303_v10  ;;  %2984 = vmatprep.subr.bf16.mxu1 %v4305_v12  ;;  %v4352_v10 = vcombine.low %v1472_v7, %v1476_v11  ;;  %v4359_v12 = vcombine.high %v1479_v21, %v1483_v22  ;;  %v4361_v13 = vcombine.high %v1480_v23, %v1484_v8  ;;  %v1495_v31 = vld [vmem:[#allocation7 + $0x700] sm:$0xff]  ;;  %v1277_v7 = vld [vmem:[#allocation7 + $0x30] sm:$0xff]  ;;  %v1274_v11 = vld [vmem:[#allocation7 + $0x18] sm:$0xff] }
 0x353   : > { %v1499_v32 = vld [vmem:[#allocation7 + $0x720] sm:$0xff] }
 0x354   : > { %v1503_v39 = vld [vmem:[#allocation7 + $0x740] sm:$0xff] }
 0x355   : > { %2899 = vmatpush1.bf16.msra.mxu0 %v4302_v26  ;;  %2985 = vmatpush1.bf16.msra.mxu1 %v4304_v27  ;;  %v1492_v26 = vld [vmem:[#allocation7 + $0x6e8] sm:$0xff]  ;;  %v4358_v27 = vcombine.low %v1479_v21, %v1483_v22  ;;  %v1507_v40 = vld [vmem:[#allocation7 + $0x760] sm:$0xff]  ;;  %v1281_v22 = vld [vmem:[#allocation7 + $0x50] sm:$0xff] }
 0x356   : > { %2900 = vmatprep.subr.bf16.mxu0 %v4311_v28  ;;  %2986 = vmatprep.subr.bf16.mxu1 %v4313_v29  ;;  %v4360_v28 = vcombine.low %v1480_v23, %v1484_v8  ;;  %v4367_v29 = vcombine.high %v1487_v14, %v1491_v24  ;;  %v4369_v30 = vcombine.high %v1488_v25, %v1492_v26  ;;  %v1511_v47 = vld [vmem:[#allocation7 + $0x780] sm:$0xff]  ;;  %v1285_v23 = vld [vmem:[#allocation7 + $0x70] sm:$0xff]  ;;  %v1282_v8 = vld [vmem:[#allocation7 + $0x58] sm:$0xff] }
 0x357   : > { %v1515_v48 = vld [vmem:[#allocation7 + $0x7a0] sm:$0xff] }
 0x358   : > { %v1519_v60 = vld [vmem:[#allocation7 + $0x7c0] sm:$0xff] }
 0x359   : > { %2901 = vmatpush1.bf16.msra.mxu0 %v4310_v34  ;;  %2987 = vmatpush1.bf16.msra.mxu1 %v4312_v35  ;;  %v1500_v34 = vld [vmem:[#allocation7 + $0x728] sm:$0xff]  ;;  %v4366_v35 = vcombine.low %v1487_v14, %v1491_v24  ;;  %v1523_v61 = vld [vmem:[#allocation7 + $0x7e0] sm:$0xff]  ;;  %v1289_v24 = vld [vmem:[#allocation7 + $0x90] sm:$0xff] }
 0x35a   : > { %2902 = vmatprep.subr.bf16.mxu0 %v4319_v36  ;;  %2988 = vmatprep.subr.bf16.mxu1 %v4321_v37  ;;  %v4368_v36 = vcombine.low %v1488_v25, %v1492_v26  ;;  %v4375_v37 = vcombine.high %v1495_v31, %v1499_v32  ;;  %v4377_v38 = vcombine.high %v1496_v33, %v1500_v34  ;;  %v1293_v25 = vld [vmem:[#allocation7 + $0xb0] sm:$0xff]  ;;  %v1290_v26 = vld [vmem:[#allocation7 + $0x98] sm:$0xff] }
 0x35d   : > { %2903 = vmatpush1.bf16.msra.mxu0 %v4318_v42  ;;  %2989 = vmatpush1.bf16.msra.mxu1 %v4320_v43  ;;  %v1508_v42 = vld [vmem:[#allocation7 + $0x768] sm:$0xff]  ;;  %v4374_v43 = vcombine.low %v1495_v31, %v1499_v32  ;;  %v1297_v32 = vld [vmem:[#allocation7 + $0xd0] sm:$0xff] }
 0x35e   : > { %2904 = vmatprep.subr.bf16.mxu0 %v4327_v44  ;;  %2990 = vmatprep.subr.bf16.mxu1 %v4329_v45  ;;  %v4376_v44 = vcombine.low %v1496_v33, %v1500_v34  ;;  %v4383_v45 = vcombine.high %v1503_v39, %v1507_v40  ;;  %v4385_v46 = vcombine.high %v1504_v41, %v1508_v42  ;;  %v1301_v33 = vld [vmem:[#allocation7 + $0xf0] sm:$0xff]  ;;  %v1298_v34 = vld [vmem:[#allocation7 + $0xd8] sm:$0xff] }
 0x361   : > { %2905 = vmatpush1.bf16.msra.mxu0 %v4326_v52  ;;  %2991 = vmatpush1.bf16.msra.mxu1 %v4328_v54  ;;  %v1516_v52 = vld [vmem:[#allocation7 + $0x7a8] sm:$0xff]  ;;  %v4382_v54 = vcombine.low %v1503_v39, %v1507_v40  ;;  %v1305_v40 = vld [vmem:[#allocation7 + $0x110] sm:$0xff] }
 0x362   : > { %2906 = vmatprep.subr.bf16.mxu0 %v4335_v55  ;;  %2992 = vmatprep.subr.bf16.mxu1 %v4337_v56  ;;  %v4384_v55 = vcombine.low %v1504_v41, %v1508_v42  ;;  %v4391_v56 = vcombine.high %v1511_v47, %v1515_v48  ;;  %v4393_v59 = vcombine.high %v1512_v49, %v1516_v52  ;;  %v1309_v41 = vld [vmem:[#allocation7 + $0x130] sm:$0xff]  ;;  %v1310_v42 = vld [vmem:[#allocation7 + $0x138] sm:$0xff] }
 0x365   : > { %2907 = vmatpush1.bf16.msra.mxu0 %v4334_v63  ;;  %2993 = vmatpush1.bf16.msra.mxu1 %v4336_v2  ;;  %v1524_v63 = vld [vmem:[#allocation7 + $0x7e8] sm:$0xff]  ;;  %v4390_v2 = vcombine.low %v1511_v47, %v1515_v48  ;;  %v1313_v47 = vld [vmem:[#allocation7 + $0x150] sm:$0xff] }
 0x366   : > { %2908 = vmatprep.subr.bf16.mxu0 %v4343_v3  ;;  %2994 = vmatprep.subr.bf16.mxu1 %v4345_v4  ;;  %v4392_v3 = vcombine.low %v1512_v49, %v1516_v52  ;;  %v4399_v4 = vcombine.high %v1519_v60, %v1523_v61  ;;  %v4401_v5 = vcombine.high %v1520_v62, %v1524_v63  ;;  %v1317_v48 = vld [vmem:[#allocation7 + $0x170] sm:$0xff]  ;;  %v1314_v49 = vld [vmem:[#allocation7 + $0x158] sm:$0xff] }
 0x367   : > { %v1318_v52 = vld [vmem:[#allocation7 + $0x178] sm:$0xff] }
 0x369   : > { %2909 = vmatpush1.bf16.msra.mxu0 %v4342_v15  ;;  %2995 = vmatpush1.bf16.msra.mxu1 %v4344_v17  ;;  %v1278_v15 = vld [vmem:[#allocation7 + $0x38] sm:$0xff]  ;;  %v4398_v17 = vcombine.low %v1519_v60, %v1523_v61  ;;  %v1321_v60 = vld [vmem:[#allocation7 + $0x190] sm:$0xff] }
 0x36a   : > { %2910 = vmatprep.subr.bf16.mxu0 %v4351_v19  ;;  %2996 = vmatprep.subr.bf16.mxu1 %v4353_v20  ;;  %v4400_v19 = vcombine.low %v1520_v62, %v1524_v63  ;;  %v4155_v20 = vcombine.high %v1273_v6, %v1277_v7  ;;  %v4157_v21 = vcombine.high %v1274_v11, %v1278_v15  ;;  %v1325_v61 = vld [vmem:[#allocation7 + $0x1b0] sm:$0xff]  ;;  %v1322_v62 = vld [vmem:[#allocation7 + $0x198] sm:$0xff] }
 0x36b   : > { %v1326_v63 = vld [vmem:[#allocation7 + $0x1b8] sm:$0xff] }
 0x36d   : > { %2911 = vmatpush1.bf16.msra.mxu0 %v4350_v9  ;;  %2997 = vmatpush1.bf16.msra.mxu1 %v4352_v10  ;;  %v1286_v9 = vld [vmem:[#allocation7 + $0x78] sm:$0xff]  ;;  %v4154_v10 = vcombine.low %v1273_v6, %v1277_v7  ;;  %v1329_v6 = vld [vmem:[#allocation7 + $0x1d0] sm:$0xff] }
 0x36e   : > { %2912 = vmatprep.subr.bf16.mxu0 %v4359_v12  ;;  %2998 = vmatprep.subr.bf16.mxu1 %v4361_v13  ;;  %v4156_v12 = vcombine.low %v1274_v11, %v1278_v15  ;;  %v4163_v13 = vcombine.high %v1281_v22, %v1285_v23  ;;  %v4165_v14 = vcombine.high %v1282_v8, %v1286_v9  ;;  %v1333_v7 = vld [vmem:[#allocation7 + $0x1f0] sm:$0xff]  ;;  %v1330_v11 = vld [vmem:[#allocation7 + $0x1d8] sm:$0xff] }
 0x36f   : > { %v1334_v15 = vld [vmem:[#allocation7 + $0x1f8] sm:$0xff] }
 0x371   : > { %2913 = vmatpush1.bf16.msra.mxu0 %v4358_v27  ;;  %2999 = vmatpush1.bf16.msra.mxu1 %v4360_v28  ;;  %v1294_v27 = vld [vmem:[#allocation7 + $0xb8] sm:$0xff]  ;;  %v4162_v28 = vcombine.low %v1281_v22, %v1285_v23  ;;  %v1337_v22 = vld [vmem:[#allocation7 + $0x210] sm:$0xff] }
 0x372   : > { %2914 = vmatprep.subr.bf16.mxu0 %v4367_v29  ;;  %3000 = vmatprep.subr.bf16.mxu1 %v4369_v30  ;;  %v4164_v29 = vcombine.low %v1282_v8, %v1286_v9  ;;  %v4171_v30 = vcombine.high %v1289_v24, %v1293_v25  ;;  %v4173_v31 = vcombine.high %v1290_v26, %v1294_v27  ;;  %v1341_v23 = vld [vmem:[#allocation7 + $0x230] sm:$0xff]  ;;  %v1338_v8 = vld [vmem:[#allocation7 + $0x218] sm:$0xff] }
 0x373   : > { %v1342_v9 = vld [vmem:[#allocation7 + $0x238] sm:$0xff] }
 0x375   : > { %2915 = vmatpush1.bf16.msra.mxu0 %v4366_v35  ;;  %3001 = vmatpush1.bf16.msra.mxu1 %v4368_v36  ;;  %v1302_v35 = vld [vmem:[#allocation7 + $0xf8] sm:$0xff]  ;;  %v4170_v36 = vcombine.low %v1289_v24, %v1293_v25  ;;  %v1345_v24 = vld [vmem:[#allocation7 + $0x250] sm:$0xff] }
 0x376   : > { %2916 = vmatprep.subr.bf16.mxu0 %v4375_v37  ;;  %3002 = vmatprep.subr.bf16.mxu1 %v4377_v38  ;;  %v4172_v37 = vcombine.low %v1290_v26, %v1294_v27  ;;  %v4179_v38 = vcombine.high %v1297_v32, %v1301_v33  ;;  %v4181_v39 = vcombine.high %v1298_v34, %v1302_v35  ;;  %v1349_v25 = vld [vmem:[#allocation7 + $0x270] sm:$0xff]  ;;  %v1346_v26 = vld [vmem:[#allocation7 + $0x258] sm:$0xff] }
 0x377   : > { %v1350_v27 = vld [vmem:[#allocation7 + $0x278] sm:$0xff] }
 0x379   : > { %2917 = vmatpush1.bf16.msra.mxu0 %v4374_v43  ;;  %3003 = vmatpush1.bf16.msra.mxu1 %v4376_v44  ;;  %v4178_v43 = vcombine.low %v1297_v32, %v1301_v33  ;;  %v4180_v44 = vcombine.low %v1298_v34, %v1302_v35  ;;  %v1353_v32 = vld [vmem:[#allocation7 + $0x290] sm:$0xff]  ;;  %v1354_v34 = vld [vmem:[#allocation7 + $0x298] sm:$0xff] }
 0x37a   : > { %2918 = vmatprep.subr.bf16.mxu0 %v4383_v45  ;;  %3004 = vmatprep.subr.bf16.mxu1 %v4385_v46  ;;  %v4187_v45 = vcombine.high %v1305_v40, %v1309_v41  ;;  %v1357_v33 = vld [vmem:[#allocation7 + $0x2b0] sm:$0xff]  ;;  %v1358_v35 = vld [vmem:[#allocation7 + $0x2b8] sm:$0xff] }
 0x37d   : > { %2919 = vmatpush1.bf16.msra.mxu0 %v4382_v54  ;;  %3005 = vmatpush1.bf16.msra.mxu1 %v4384_v55  ;;  %v4186_v54 = vcombine.low %v1305_v40, %v1309_v41  ;;  %v1361_v40 = vld [vmem:[#allocation7 + $0x2d0] sm:$0xff] }
 0x37e   : > { %2920 = vmatprep.subr.bf16.mxu0 %v4391_v56  ;;  %3006 = vmatprep.subr.bf16.mxu1 %v4393_v59  ;;  %v4195_v56 = vcombine.high %v1313_v47, %v1317_v48  ;;  %v4197_v59 = vcombine.high %v1314_v49, %v1318_v52  ;;  %v1365_v41 = vld [vmem:[#allocation7 + $0x2f0] sm:$0xff] }
 0x381   : > { %2921 = vmatpush1.bf16.msra.mxu0 %v4390_v2  ;;  %3007 = vmatpush1.bf16.msra.mxu1 %v4392_v3  ;;  %v4194_v2 = vcombine.low %v1313_v47, %v1317_v48  ;;  %v4196_v3 = vcombine.low %v1314_v49, %v1318_v52  ;;  %v1369_v47 = vld [vmem:[#allocation7 + $0x310] sm:$0xff]  ;;  %v1370_v49 = vld [vmem:[#allocation7 + $0x318] sm:$0xff] }
 0x382   : > { %2922 = vmatprep.subr.bf16.mxu0 %v4399_v4  ;;  %3008 = vmatprep.subr.bf16.mxu1 %v4401_v5  ;;  %v4203_v4 = vcombine.high %v1321_v60, %v1325_v61  ;;  %v4205_v5 = vcombine.high %v1322_v62, %v1326_v63  ;;  %v1373_v48 = vld [vmem:[#allocation7 + $0x330] sm:$0xff]  ;;  %v1374_v52 = vld [vmem:[#allocation7 + $0x338] sm:$0xff] }
 0x385   : > { %2923 = vmatpush1.bf16.msra.mxu0 %v4398_v17  ;;  %3009 = vmatpush1.bf16.msra.mxu1 %v4400_v19  ;;  %v4202_v17 = vcombine.low %v1321_v60, %v1325_v61  ;;  %v4204_v19 = vcombine.low %v1322_v62, %v1326_v63  ;;  %v1377_v60 = vld [vmem:[#allocation7 + $0x350] sm:$0xff]  ;;  %v1378_v62 = vld [vmem:[#allocation7 + $0x358] sm:$0xff] }
 0x386   : > { %3021 = vmatprep.subr.bf16.mxu0 %v4155_v20  ;;  %3107 = vmatprep.subr.bf16.mxu1 %v4157_v21  ;;  %v4211_v20 = vcombine.high %v1329_v6, %v1333_v7  ;;  %v4213_v21 = vcombine.high %v1330_v11, %v1334_v15  ;;  %v1381_v61 = vld [vmem:[#allocation7 + $0x370] sm:$0xff]  ;;  %v1382_v63 = vld [vmem:[#allocation7 + $0x378] sm:$0xff] }
 0x388   : > { %2925 = vmatmul.mubr.bf16.vlgmr.msra.gmra.mrb[8].mxu0 %v5340_v58  ;;  %3011 = vmatmul.mubr.bf16.vlgmr.msra.gmra.mrb[8].mxu1 %v5340_v58 }
 0x389   : > { %3022 = vmatpush1.bf16.msra.mxu0 %v4154_v10  ;;  %3053 = vmatprep.mubr.bf16.mxu0 %v5342_v0  ;;  %v4210_v10 = vcombine.low %v1329_v6, %v1333_v7  ;;  %v1385_v6 = vld [vmem:[#allocation7 + $0x390] sm:$0xff] }
 0x38a   : > { %3108 = vmatpush1.bf16.msra.mxu1 %v4156_v12  ;;  %3139 = vmatprep.mubr.bf16.mxu1 %v5342_v0  ;;  %v1306_v0 = vld [vmem:[#allocation7 + $0x118] sm:$0xff]  ;;  %v4212_v12 = vcombine.low %v1330_v11, %v1334_v15  ;;  %v1389_v7 = vld [vmem:[#allocation7 + $0x3b0] sm:$0xff] }
 0x38b   : > { %3023 = vmatprep.subr.bf16.mxu0 %v4163_v13  ;;  %3109 = vmatprep.subr.bf16.mxu1 %v4165_v14  ;;  %v4189_v46 = vcombine.high %v1306_v0, %v1310_v42  ;;  %v4188_v55 = vcombine.low %v1306_v0, %v1310_v42  ;;  %v4219_v13 = vcombine.high %v1337_v22, %v1341_v23  ;;  %v1362_v0 = vld [vmem:[#allocation7 + $0x2d8] sm:$0xff] }
 0x38c   : > { %v4221_v14 = vcombine.high %v1338_v8, %v1342_v9  ;;  %v1366_v42 = vld [vmem:[#allocation7 + $0x2f8] sm:$0xff] }
 0x38d   : > { %3024 = vmatpush1.bf16.msra.mxu0 %v4162_v28  ;;  %v4218_v28 = vcombine.low %v1337_v22, %v1341_v23  ;;  %v1386_v11 = vld [vmem:[#allocation7 + $0x398] sm:$0xff]  ;;  %v1393_v22 = vld [vmem:[#allocation7 + $0x3d0] sm:$0xff] }
 0x38e   : > { %3110 = vmatpush1.bf16.msra.mxu1 %v4164_v29  ;;  %3025 = vmatprep.subr.bf16.mxu0 %v4171_v30  ;;  %v4220_v29 = vcombine.low %v1338_v8, %v1342_v9  ;;  %v4227_v30 = vcombine.high %v1345_v24, %v1349_v25  ;;  %v1390_v15 = vld [vmem:[#allocation7 + $0x3b8] sm:$0xff]  ;;  %v1397_v23 = vld [vmem:[#allocation7 + $0x3f0] sm:$0xff] }
 0x38f   : > { %3111 = vmatprep.subr.bf16.mxu1 %v4173_v31  ;;  %v4229_v31 = vcombine.high %v1346_v26, %v1350_v27  ;;  %v1394_v8 = vld [vmem:[#allocation7 + $0x3d8] sm:$0xff] }
 0x390   : > { %v1398_v9 = vld [vmem:[#allocation7 + $0x3f8] sm:$0xff] }
 0x391   : > { %3026 = vmatpush1.bf16.msra.mxu0 %v4170_v36  ;;  %v4226_v36 = vcombine.low %v1345_v24, %v1349_v25  ;;  %v1401_v24 = vld [vmem:[#allocation7 + $0x410] sm:$0xff] }
 0x392   : > { %3112 = vmatpush1.bf16.msra.mxu1 %v4172_v37  ;;  %3027 = vmatprep.subr.bf16.mxu0 %v4179_v38  ;;  %v4228_v37 = vcombine.low %v1346_v26, %v1350_v27  ;;  %v4235_v38 = vcombine.high %v1353_v32, %v1357_v33  ;;  %v1405_v25 = vld [vmem:[#allocation7 + $0x430] sm:$0xff]  ;;  %v1402_v26 = vld [vmem:[#allocation7 + $0x418] sm:$0xff] }
 0x393   : > { %3113 = vmatprep.subr.bf16.mxu1 %v4181_v39  ;;  %v4237_v39 = vcombine.high %v1354_v34, %v1358_v35  ;;  %v1406_v27 = vld [vmem:[#allocation7 + $0x438] sm:$0xff] }
 0x395   : > { %3028 = vmatpush1.bf16.msra.mxu0 %v4178_v43  ;;  %v4234_v43 = vcombine.low %v1353_v32, %v1357_v33  ;;  %v1409_v32 = vld [vmem:[#allocation7 + $0x450] sm:$0xff] }
 0x396   : > { %3114 = vmatpush1.bf16.msra.mxu1 %v4180_v44  ;;  %3029 = vmatprep.subr.bf16.mxu0 %v4187_v45  ;;  %v4236_v44 = vcombine.low %v1354_v34, %v1358_v35  ;;  %v4243_v45 = vcombine.high %v1361_v40, %v1365_v41  ;;  %v1413_v33 = vld [vmem:[#allocation7 + $0x470] sm:$0xff]  ;;  %v4282_v34 = vcombine.low %v1401_v24, %v1405_v25  ;;  %v1410_v35 = vld [vmem:[#allocation7 + $0x458] sm:$0xff] }
 0x397   : > { %3115 = vmatprep.subr.bf16.mxu1 %v4189_v46  ;;  %v4245_v46 = vcombine.high %v1362_v0, %v1366_v42 }
 0x399   : > { %3030 = vmatpush1.bf16.msra.mxu0 %v4186_v54  ;;  %v4242_v54 = vcombine.low %v1361_v40, %v1365_v41  ;;  %v1421_v40 = vld [vmem:[#allocation7 + $0x4b0] sm:$0xff] }
 0x39a   : > { %3116 = vmatpush1.bf16.msra.mxu1 %v4188_v55  ;;  %3031 = vmatprep.subr.bf16.mxu0 %v4195_v56  ;;  %v4244_v55 = vcombine.low %v1362_v0, %v1366_v42  ;;  %v4251_v56 = vcombine.high %v1369_v47, %v1373_v48  ;;  %v1418_v0 = vld [vmem:[#allocation7 + $0x498] sm:$0xff] }
 0x39b   : > { %3117 = vmatprep.subr.bf16.mxu1 %v4197_v59  ;;  %v4253_v59 = vcombine.high %v1370_v49, %v1374_v52  ;;  %v1422_v42 = vld [vmem:[#allocation7 + $0x4b8] sm:$0xff] }
 0x39d   : > { %3032 = vmatpush1.bf16.msra.mxu0 %v4194_v2  ;;  %v4250_v2 = vcombine.low %v1369_v47, %v1373_v48  ;;  %v1425_v47 = vld [vmem:[#allocation7 + $0x4d0] sm:$0xff] }
 0x39e   : > { %3118 = vmatpush1.bf16.msra.mxu1 %v4196_v3  ;;  %3033 = vmatprep.subr.bf16.mxu0 %v4203_v4  ;;  %v4252_v3 = vcombine.low %v1370_v49, %v1374_v52  ;;  %v4259_v4 = vcombine.high %v1377_v60, %v1381_v61  ;;  %v1429_v48 = vld [vmem:[#allocation7 + $0x4f0] sm:$0xff]  ;;  %v1426_v49 = vld [vmem:[#allocation7 + $0x4d8] sm:$0xff] }
 0x39f   : > { %3119 = vmatprep.subr.bf16.mxu1 %v4205_v5  ;;  %v4261_v5 = vcombine.high %v1378_v62, %v1382_v63  ;;  %v1430_v52 = vld [vmem:[#allocation7 + $0x4f8] sm:$0xff] }
 0x3a1   : > { %3034 = vmatpush1.bf16.msra.mxu0 %v4202_v17  ;;  %v4258_v17 = vcombine.low %v1377_v60, %v1381_v61  ;;  %v1437_v60 = vld [vmem:[#allocation7 + $0x530] sm:$0xff]  ;;  %v1434_v61 = vld [vmem:[#allocation7 + $0x518] sm:$0xff] }
 0x3a2   : > { %3120 = vmatpush1.bf16.msra.mxu1 %v4204_v19  ;;  %3035 = vmatprep.subr.bf16.mxu0 %v4211_v20  ;;  %v4260_v19 = vcombine.low %v1378_v62, %v1382_v63  ;;  %v4267_v20 = vcombine.high %v1385_v6, %v1389_v7  ;;  %v1438_v62 = vld [vmem:[#allocation7 + $0x538] sm:$0xff]  ;;  %v4308_v63 = vcombine.low %v1426_v49, %v1430_v52 }
 0x3a3   : > { %3121 = vmatprep.subr.bf16.mxu1 %v4213_v21  ;;  %v4269_v21 = vcombine.high %v1386_v11, %v1390_v15 }
 0x3a5   : > { %3036 = vmatpush1.bf16.msra.mxu0 %v4210_v10  ;;  %v4266_v10 = vcombine.low %v1385_v6, %v1389_v7  ;;  %v1442_v6 = vld [vmem:[#allocation7 + $0x558] sm:$0xff] }
 0x3a6   : > { %3122 = vmatpush1.bf16.msra.mxu1 %v4212_v12  ;;  %3037 = vmatprep.subr.bf16.mxu0 %v4219_v13  ;;  %v4268_v12 = vcombine.low %v1386_v11, %v1390_v15  ;;  %v4275_v13 = vcombine.high %v1393_v22, %v1397_v23  ;;  %v1446_v7 = vld [vmem:[#allocation7 + $0x578] sm:$0xff]  ;;  %v4316_v15 = vcombine.low %v1434_v61, %v1438_v62 }
 0x3a7   : > { %3123 = vmatprep.subr.bf16.mxu1 %v4221_v14  ;;  %v4277_v14 = vcombine.high %v1394_v8, %v1398_v9 }
 0x3a9   : > { %3038 = vmatpush1.bf16.msra.mxu0 %v4218_v28  ;;  %v4274_v28 = vcombine.low %v1393_v22, %v1397_v23  ;;  %v1450_v22 = vld [vmem:[#allocation7 + $0x598] sm:$0xff] }
 0x3aa   : > { %3124 = vmatpush1.bf16.msra.mxu1 %v4220_v29  ;;  %3039 = vmatprep.subr.bf16.mxu0 %v4227_v30  ;;  %v4276_v29 = vcombine.low %v1394_v8, %v1398_v9  ;;  %v4283_v30 = vcombine.high %v1401_v24, %v1405_v25  ;;  %v1454_v23 = vld [vmem:[#allocation7 + $0x5b8] sm:$0xff]  ;;  %v4324_v9 = vcombine.low %v1442_v6, %v1446_v7 }
 0x3ab   : > { %3125 = vmatprep.subr.bf16.mxu1 %v4229_v31  ;;  %v4285_v31 = vcombine.high %v1402_v26, %v1406_v27  ;;  %v1458_v24 = vld [vmem:[#allocation7 + $0x5d8] sm:$0xff] }
 0x3ac   : > { %v1462_v25 = vld [vmem:[#allocation7 + $0x5f8] sm:$0xff] }
 0x3ad   : > { %3040 = vmatpush1.bf16.msra.mxu0 %v4226_v36  ;;  %v1414_v36 = vld [vmem:[#allocation7 + $0x478] sm:$0xff] }
 0x3ae   : > { %3126 = vmatpush1.bf16.msra.mxu1 %v4228_v37  ;;  %3041 = vmatprep.subr.bf16.mxu0 %v4235_v38  ;;  %v4284_v37 = vcombine.low %v1402_v26, %v1406_v27  ;;  %v4291_v38 = vcombine.high %v1409_v32, %v1413_v33  ;;  %v4293_v41 = vcombine.high %v1410_v35, %v1414_v36 }
 0x3af   : > { %3127 = vmatprep.subr.bf16.mxu1 %v4237_v39  ;;  %v1417_v39 = vld [vmem:[#allocation7 + $0x490] sm:$0xff]  ;;  %v4332_v27 = vcombine.low %v1450_v22, %v1454_v23 }
 0x3b1   : > { %3042 = vmatpush1.bf16.msra.mxu0 %v4234_v43  ;;  %v4290_v43 = vcombine.low %v1409_v32, %v1413_v33  ;;  %v1466_v32 = vld [vmem:[#allocation7 + $0x618] sm:$0xff] }
 0x3b2   : > { %3128 = vmatpush1.bf16.msra.mxu1 %v4236_v44  ;;  %3043 = vmatprep.subr.bf16.mxu0 %v4243_v45  ;;  %v4292_v44 = vcombine.low %v1410_v35, %v1414_v36  ;;  %v4299_v45 = vcombine.high %v1417_v39, %v1421_v40  ;;  %v1470_v33 = vld [vmem:[#allocation7 + $0x638] sm:$0xff]  ;;  %v4340_v35 = vcombine.low %v1458_v24, %v1462_v25 }
 0x3b3   : > { %3129 = vmatprep.subr.bf16.mxu1 %v4245_v46  ;;  %v4301_v46 = vcombine.high %v1418_v0, %v1422_v42 }
 0x3b5   : > { %3044 = vmatpush1.bf16.msra.mxu0 %v4242_v54  ;;  %v4298_v54 = vcombine.low %v1417_v39, %v1421_v40  ;;  %v1477_v39 = vld [vmem:[#allocation7 + $0x670] sm:$0xff]  ;;  %v1474_v40 = vld [vmem:[#allocation7 + $0x658] sm:$0xff] }
 0x3b6   : > { %3130 = vmatpush1.bf16.msra.mxu1 %v4244_v55  ;;  %3045 = vmatprep.subr.bf16.mxu0 %v4251_v56  ;;  %v4307_v55 = vcombine.high %v1425_v47, %v1429_v48  ;;  %v4309_v56 = vcombine.high %v1426_v49, %v1430_v52 }
 0x3b7   : > { %3131 = vmatprep.subr.bf16.mxu1 %v4253_v59  ;;  %v1433_v59 = vld [vmem:[#allocation7 + $0x510] sm:$0xff] }
 0x3b8   : > { %v4314_v11 = vcombine.low %v1433_v59, %v1437_v60 }
 0x3b9   : > { %3046 = vmatpush1.bf16.msra.mxu0 %v4250_v2  ;;  %v4315_v2 = vcombine.high %v1433_v59, %v1437_v60  ;;  %v1490_v59 = vld [vmem:[#allocation7 + $0x6d8] sm:$0xff] }
 0x3ba   : > { %3132 = vmatpush1.bf16.msra.mxu1 %v4252_v3  ;;  %3047 = vmatprep.subr.bf16.mxu0 %v4259_v4  ;;  %v4317_v3 = vcombine.high %v1434_v61, %v1438_v62  ;;  %v1441_v4 = vld [vmem:[#allocation7 + $0x550] sm:$0xff]  ;;  %v1494_v60 = vld [vmem:[#allocation7 + $0x6f8] sm:$0xff] }
 0x3bb   : > { %3133 = vmatprep.subr.bf16.mxu1 %v4261_v5  ;;  %v1445_v5 = vld [vmem:[#allocation7 + $0x570] sm:$0xff] }
 0x3bc   : > { %v4322_v8 = vcombine.low %v1441_v4, %v1445_v5 }
 0x3bd   : > { %3048 = vmatpush1.bf16.msra.mxu0 %v4258_v17  ;;  %v4323_v17 = vcombine.high %v1441_v4, %v1445_v5  ;;  %v1498_v4 = vld [vmem:[#allocation7 + $0x718] sm:$0xff] }
 0x3be   : > { %3134 = vmatpush1.bf16.msra.mxu1 %v4260_v19  ;;  %3049 = vmatprep.subr.bf16.mxu0 %v4267_v20  ;;  %v4325_v19 = vcombine.high %v1442_v6, %v1446_v7  ;;  %v1449_v20 = vld [vmem:[#allocation7 + $0x590] sm:$0xff]  ;;  %v1502_v5 = vld [vmem:[#allocation7 + $0x738] sm:$0xff]  ;;  %v4372_v7 = vcombine.low %v1490_v59, %v1494_v60 }
 0x3bf   : > { %3135 = vmatprep.subr.bf16.mxu1 %v4269_v21  ;;  %v1453_v21 = vld [vmem:[#allocation7 + $0x5b0] sm:$0xff] }
 0x3c0   : > { %v4330_v26 = vcombine.low %v1449_v20, %v1453_v21 }
 0x3c1   : > { %3050 = vmatpush1.bf16.msra.mxu0 %v4266_v10  ;;  %v4331_v10 = vcombine.high %v1449_v20, %v1453_v21  ;;  %v1506_v20 = vld [vmem:[#allocation7 + $0x758] sm:$0xff] }
 0x3c2   : > { %3136 = vmatpush1.bf16.msra.mxu1 %v4268_v12  ;;  %3051 = vmatprep.subr.bf16.mxu0 %v4275_v13  ;;  %v4333_v12 = vcombine.high %v1450_v22, %v1454_v23  ;;  %v1457_v13 = vld [vmem:[#allocation7 + $0x5d0] sm:$0xff]  ;;  %v1510_v21 = vld [vmem:[#allocation7 + $0x778] sm:$0xff]  ;;  %v4380_v23 = vcombine.low %v1498_v4, %v1502_v5 }
 0x3c3   : > { %3137 = vmatprep.subr.bf16.mxu1 %v4277_v14  ;;  %v1461_v14 = vld [vmem:[#allocation7 + $0x5f0] sm:$0xff] }
 0x3c5   : > { %3052 = vmatpush1.bf16.msra.mxu0 %v4274_v28  ;;  %v4339_v28 = vcombine.high %v1457_v13, %v1461_v14 }
 0x3c6   : > { %3138 = vmatpush1.bf16.msra.mxu1 %v4276_v29  ;;  %3064 = vmatprep.subr.bf16.mxu0 %v4283_v30  ;;  %v4341_v29 = vcombine.high %v1458_v24, %v1462_v25  ;;  %v1465_v30 = vld [vmem:[#allocation7 + $0x610] sm:$0xff]  ;;  %v4388_v25 = vcombine.low %v1506_v20, %v1510_v21 }
 0x3c7   : > { %3150 = vmatprep.subr.bf16.mxu1 %v4285_v31  ;;  %v1469_v31 = vld [vmem:[#allocation7 + $0x630] sm:$0xff] }
 0x3c8   : > { %3054 = vmatmul.mubr.bf16.vlgmr.msra.gmra.mrb[12].mxu0 %v5338_v57  ;;  %v4347_v36 = vcombine.high %v1465_v30, %v1469_v31 }
 0x3c9   : > { %3140 = vmatmul.mubr.bf16.vlgmr.msra.gmra.mrb[12].mxu1 %v5338_v57  ;;  %3065 = vmatpush1.bf16.msra.mxu0 %v4282_v34  ;;  %v4300_v57 = vcombine.low %v1418_v0, %v1422_v42  ;;  %v4338_v34 = vcombine.low %v1457_v13, %v1461_v14  ;;  %v4346_v0 = vcombine.low %v1465_v30, %v1469_v31  ;;  %v1514_v13 = vld [vmem:[#allocation7 + $0x798] sm:$0xff] }
 0x3ca   : > { %3096 = vmatprep.mubr.bf16.mxu0 %v5344_v1  ;;  %3151 = vmatpush1.bf16.msra.mxu1 %v4284_v37  ;;  %v4349_v37 = vcombine.high %v1466_v32, %v1470_v33  ;;  %v4348_v42 = vcombine.low %v1466_v32, %v1470_v33  ;;  %v1518_v14 = vld [vmem:[#allocation7 + $0x7b8] sm:$0xff] }
 0x3cb   : > { %3182 = vmatprep.mubr.bf16.mxu1 %v5344_v1  ;;  %3066 = vmatprep.subr.bf16.mxu0 %v4291_v38  ;;  %v4306_v1 = vcombine.low %v1425_v47, %v1429_v48  ;;  %v1473_v38 = vld [vmem:[#allocation7 + $0x650] sm:$0xff]  ;;  %v1482_v47 = vld [vmem:[#allocation7 + $0x698] sm:$0xff]  ;;  %v4396_v33 = vcombine.low %v1514_v13, %v1518_v14 }
 0x3cc   : > { %3152 = vmatprep.subr.bf16.mxu1 %v4293_v41  ;;  %v1478_v41 = vld [vmem:[#allocation7 + $0x678] sm:$0xff]  ;;  %v4354_v49 = vcombine.low %v1473_v38, %v1477_v39 }
 0x3cd   : > { %3067 = vmatpush1.bf16.msra.mxu0 %v4290_v43  ;;  %v4355_v43 = vcombine.high %v1473_v38, %v1477_v39  ;;  %v1486_v48 = vld [vmem:[#allocation7 + $0x6b8] sm:$0xff]  ;;  %v4356_v52 = vcombine.low %v1474_v40, %v1478_v41  ;;  %v4820_v38 = vld [vmem:[#allocation9 + $0x40] sm:$0xff]  }
 0x3ce   : > { %3153 = vmatpush1.bf16.msra.mxu1 %v4292_v44  ;;  %3068 = vmatprep.subr.bf16.mxu0 %v4299_v45  ;;  %v4357_v44 = vcombine.high %v1474_v40, %v1478_v41  ;;  %v1481_v45 = vld [vmem:[#allocation7 + $0x690] sm:$0xff]  ;;  %v4364_v62 = vcombine.low %v1482_v47, %v1486_v48  ;;  %v1522_v30 = vld [vmem:[#allocation7 + $0x7d8] sm:$0xff]  ;;  %v4821_v39 = vld [vmem:[#allocation9 + $0xc0] sm:$0xff]  }
 0x3cf   : > { %3154 = vmatprep.subr.bf16.mxu1 %v4301_v46  ;;  %v1485_v46 = vld [vmem:[#allocation7 + $0x6b0] sm:$0xff]  ;;  %v1526_v31 = vld [vmem:[#allocation7 + $0x7f8] sm:$0xff]  ;;  %v4822_v40 = vld [vmem:[#allocation9] sm:$0xff]  }
 0x3d0   : > { %v4362_v61 = vcombine.low %v1481_v45, %v1485_v46  ;;  %v4823_v41 = vld [vmem:[#allocation9 + $0x80] sm:$0xff]  }
 0x3d1   : > { %3069 = vmatpush1.bf16.msra.mxu0 %v4298_v54  ;;  %v4363_v54 = vcombine.high %v1481_v45, %v1485_v46  ;;  %v4828_v45 = vld [vmem:[#allocation9 + $0x50] sm:$0xff]  }
 0x3d2   : > { %3155 = vmatpush1.bf16.msra.mxu1 %v4300_v57  ;;  %3070 = vmatprep.subr.bf16.mxu0 %v4307_v55  ;;  %v4365_v57 = vcombine.high %v1482_v47, %v1486_v48  ;;  %v1489_v55 = vld [vmem:[#allocation7 + $0x6d0] sm:$0xff] }
 0x3d3   : > { %3156 = vmatprep.subr.bf16.mxu1 %v4309_v56  ;;  %v1493_v56 = vld [vmem:[#allocation7 + $0x6f0] sm:$0xff] }
 0x3d4   : > { %v4370_v6 = vcombine.low %v1489_v55, %v1493_v56  ;;  %v4829_v46 = vld [vmem:[#allocation9 + $0xd0] sm:$0xff]  }
 0x3d5   : > { %3071 = vmatpush1.bf16.msra.mxu0 %v4306_v1  ;;  %v4371_v1 = vcombine.high %v1489_v55, %v1493_v56  ;;  %v4830_v47 = vld [vmem:[#allocation9 + $0x10] sm:$0xff]   ;;  %v4837_v55 = vld [vmem:[#allocation9 + $0xe0] sm:$0xff]  }
 0x3d6   : > { %3157 = vmatpush1.bf16.msra.mxu1 %v4308_v63  ;;  %3072 = vmatprep.subr.bf16.mxu0 %v4315_v2  ;;  %v4373_v63 = vcombine.high %v1490_v59, %v1494_v60  ;;  %v1497_v2 = vld [vmem:[#allocation7 + $0x710] sm:$0xff]  ;;  %v4838_v56 = vld [vmem:[#allocation9 + $0x20] sm:$0xff]   ;;  %v4840_v60 = vld [vmem:[#allocation9 + $0x68] sm:$0xff]  }
 0x3d7   : > { %3158 = vmatprep.subr.bf16.mxu1 %v4317_v3  ;;  %v1501_v3 = vld [vmem:[#allocation7 + $0x730] sm:$0xff]  ;;  %v4839_v59 = vld [vmem:[#allocation9 + $0xa0] sm:$0xff]  }
 0x3d8   : > { %v4378_v22 = vcombine.low %v1497_v2, %v1501_v3  ;;  %v4831_v48 = vld [vmem:[#allocation9 + $0x90] sm:$0xff]  }
 0x3d9   : > { %3073 = vmatpush1.bf16.msra.mxu0 %v4314_v11  ;;  %v4379_v11 = vcombine.high %v1497_v2, %v1501_v3  ;;  %v4845_v2 = vld [vmem:[#allocation9 + $0xf0] sm:$0xff]  }
 0x3da   : > { %3159 = vmatpush1.bf16.msra.mxu1 %v4316_v15  ;;  %3074 = vmatprep.subr.bf16.mxu0 %v4323_v17  ;;  %v4381_v15 = vcombine.high %v1498_v4, %v1502_v5  ;;  %v1505_v17 = vld [vmem:[#allocation7 + $0x750] sm:$0xff]  ;;  %v4848_v5 = vld [vmem:[#allocation9 + $0x78] sm:$0xff]  }
 0x3db   : > { %3160 = vmatprep.subr.bf16.mxu1 %v4325_v19  ;;  %v1509_v19 = vld [vmem:[#allocation7 + $0x770] sm:$0xff] }
 0x3dc   : > { %v4386_v24 = vcombine.low %v1505_v17, %v1509_v19  ;;  %v4846_v3 = vld [vmem:[#allocation9 + $0x30] sm:$0xff]  }
 0x3dd   : > { %3075 = vmatpush1.bf16.msra.mxu0 %v4322_v8  ;;  %v4387_v8 = vcombine.high %v1505_v17, %v1509_v19  ;;  %v4847_v4 = vld [vmem:[#allocation9 + $0xb0] sm:$0xff]   ;;  %v4853_v17 = vld [vmem:[#allocation9 + $0x1c0] sm:$0xff]  }
 0x3de   : > { %3161 = vmatpush1.bf16.msra.mxu1 %v4324_v9  ;;  %3076 = vmatprep.subr.bf16.mxu0 %v4331_v10  ;;  %v4389_v9 = vcombine.high %v1506_v20, %v1510_v21  ;;  %v1513_v10 = vld [vmem:[#allocation7 + $0x790] sm:$0xff]  ;;  %v5371_v19 = vld [vmem:[%s5415_s8] sm:$0xff] }
 0x3df   : > { %3162 = vmatprep.subr.bf16.mxu1 %v4333_v12  ;;  %v1517_v12 = vld [vmem:[#allocation7 + $0x7b0] sm:$0xff]  ;;  %v1532_v20 = vrot.slane %v5371_v19, %v5299_v51  ;;  %v1540_v21 = vrot.slane %v5371_v19, %v827_v16 }
 0x3e0   : > { %v4394_v32 = vcombine.low %v1513_v10, %v1517_v12 }
 0x3e1   : > { %3077 = vmatpush1.bf16.msra.mxu0 %v4330_v26  ;;  %v4395_v26 = vcombine.high %v1513_v10, %v1517_v12 }
 0x3e2   : > { %3163 = vmatpush1.bf16.msra.mxu1 %v4332_v27  ;;  %3078 = vmatprep.subr.bf16.mxu0 %v4339_v28  ;;  %v4397_v27 = vcombine.high %v1514_v13, %v1518_v14  ;;  %v1521_v28 = vld [vmem:[#allocation7 + $0x7d0] sm:$0xff] }
 0x3e3   : > { %3164 = vmatprep.subr.bf16.mxu1 %v4341_v29  ;;  %v1525_v29 = vld [vmem:[#allocation7 + $0x7f0] sm:$0xff] }
 0x3e5   : > { %3079 = vmatpush1.bf16.msra.mxu0 %v4338_v34  ;;  %v4403_v34 = vcombine.high %v1521_v28, %v1525_v29 }
 0x3e6   : > { %3165 = vmatpush1.bf16.msra.mxu1 %v4340_v35  ;;  %3080 = vmatprep.subr.bf16.mxu0 %v4347_v36  ;;  %v4405_v35 = vcombine.high %v1522_v30, %v1526_v31  ;;  %v4402_v36 = vcombine.low %v1521_v28, %v1525_v29 }
 0x3e7   : > { %3166 = vmatprep.subr.bf16.mxu1 %v4349_v37  ;;  %v4404_v37 = vcombine.low %v1522_v30, %v1526_v31 }
 0x3e9   : > { %3081 = vmatpush1.bf16.msra.mxu0 %v4346_v0  ;;  %v4824_v0 = vld [vmem:[#allocation9 + $0x48] sm:$0xff]  }
 0x3ea   : > { %3167 = vmatpush1.bf16.msra.mxu1 %v4348_v42  ;;  %3082 = vmatprep.subr.bf16.mxu0 %v4355_v43  ;;  %v4825_v42 = vld [vmem:[#allocation9 + $0xc8] sm:$0xff]  }
 0x3eb   : > { %3168 = vmatprep.subr.bf16.mxu1 %v4357_v44  ;;  %v4826_v43 = vld [vmem:[#allocation9 + $0x8] sm:$0xff]  }
 0x3ec   : > { %v4827_v44 = vld [vmem:[#allocation9 + $0x88] sm:$0xff]  }
 0x3ed   : > { %3083 = vmatpush1.bf16.msra.mxu0 %v4354_v49  ;;  %v4832_v49 = vld [vmem:[#allocation9 + $0x58] sm:$0xff]  }
 0x3ee   : > { %3169 = vmatpush1.bf16.msra.mxu1 %v4356_v52  ;;  %3084 = vmatprep.subr.bf16.mxu0 %v4363_v54  ;;  %v4833_v52 = vld [vmem:[#allocation9 + $0xd8] sm:$0xff]  }
 0x3ef   : > { %3170 = vmatprep.subr.bf16.mxu1 %v4365_v57  ;;  %v4834_v54 = vld [vmem:[#allocation9 + $0x18] sm:$0xff]   ;;  %v4836_v57 = vld [vmem:[#allocation9 + $0x60] sm:$0xff]  }
 0x3f1   : > { %3085 = vmatpush1.bf16.msra.mxu0 %v4362_v61  ;;  %v4841_v61 = vld [vmem:[#allocation9 + $0xe8] sm:$0xff]  }
 0x3f2   : > { %3171 = vmatpush1.bf16.msra.mxu1 %v4364_v62  ;;  %3086 = vmatprep.subr.bf16.mxu0 %v4371_v1  ;;  %v4842_v62 = vld [vmem:[#allocation9 + $0x28] sm:$0xff]  }
 0x3f3   : > { %3172 = vmatprep.subr.bf16.mxu1 %v4373_v63  ;;  %v4843_v1 = vld [vmem:[#allocation9 + $0xa8] sm:$0xff]   ;;  %v4844_v63 = vld [vmem:[#allocation9 + $0x70] sm:$0xff]  }
 0x3f5   : > { %3087 = vmatpush1.bf16.msra.mxu0 %v4370_v6  ;;  %v4849_v6 = vld [vmem:[#allocation9 + $0xf8] sm:$0xff]  }
 0x3f6   : > { %3173 = vmatpush1.bf16.msra.mxu1 %v4372_v7  ;;  %3088 = vmatprep.subr.bf16.mxu0 %v4379_v11  ;;  %v4850_v7 = vld [vmem:[#allocation9 + $0x38] sm:$0xff]  }
 0x3f7   : > { %3174 = vmatprep.subr.bf16.mxu1 %v4381_v15  ;;  %v4851_v11 = vld [vmem:[#allocation9 + $0xb8] sm:$0xff]   ;;  %v4852_v15 = vld [vmem:[#allocation9 + $0x140] sm:$0xff]  }
 0x3f9   : > { %3089 = vmatpush1.bf16.msra.mxu0 %v4378_v22  ;;  %v1536_v22 = vrot.slane %v5371_v19, %v5305_v53 }
 0x3fa   : > { %3175 = vmatpush1.bf16.msra.mxu1 %v4380_v23  ;;  %3090 = vmatprep.subr.bf16.mxu0 %v4387_v8  ;;  %v1544_v23 = vrot.slane %v5371_v19, %v831_v18 }
 0x3fb   : > { %3176 = vmatprep.subr.bf16.mxu1 %v4389_v9 }
 0x3fd   : > { %3091 = vmatpush1.bf16.msra.mxu0 %v4386_v24 }
 0x3fe   : > { %3177 = vmatpush1.bf16.msra.mxu1 %v4388_v25  ;;  %3092 = vmatprep.subr.bf16.mxu0 %v4395_v26 }
 0x3ff   : > { %3178 = vmatprep.subr.bf16.mxu1 %v4397_v27 }
 0x401   : > { %3093 = vmatpush1.bf16.msra.mxu0 %v4394_v32 }
 0x402   : > { %3179 = vmatpush1.bf16.msra.mxu1 %v4396_v33  ;;  %3094 = vmatprep.subr.bf16.mxu0 %v4403_v34 }
 0x403   : > { %3180 = vmatprep.subr.bf16.mxu1 %v4405_v35 }
 0x405   : > { %3095 = vmatpush1.bf16.msra.mxu0 %v4402_v36 }
 0x406   : > { %3181 = vmatpush1.bf16.msra.mxu1 %v4404_v37  ;;  %4482 = vmatprep.subr.bf16.mxu0 %v4820_v38 }
 0x407   : > { %4504 = vmatprep.subr.bf16.mxu1 %v4821_v39 }
 0x408   : > { %3097 = vmatmul.mubr.bf16.vlgmr.msra.gmra.mrb[12].mxu0 %v5340_v58 }
 0x409   : > { %3183 = vmatmul.mubr.bf16.vlgmr.msra.gmra.mrb[12].mxu1 %v5340_v58  ;;  %4483 = vmatpush3.bf16.msra.mxu0 %v4822_v40  ;;  %v4835_v58 = vld [vmem:[#allocation9 + $0x98] sm:$0xff]  }
 0x40a   : > { %4505 = vmatpush3.bf16.msra.mxu1 %v4823_v41  ;;  %4484 = vmatprep.subr.bf16.mxu0 %v4824_v0 }
 0x40b   : > { %4506 = vmatprep.subr.bf16.mxu1 %v4825_v42 }
 0x40d   : > { %4485 = vmatpush3.bf16.msra.mxu0 %v4826_v43 }
 0x40e   : > { %4507 = vmatpush3.bf16.msra.mxu1 %v4827_v44  ;;  %4486 = vmatprep.subr.bf16.mxu0 %v4828_v45 }
 0x40f   : > { %4508 = vmatprep.subr.bf16.mxu1 %v4829_v46 }
 0x411   : > { %4487 = vmatpush3.bf16.msra.mxu0 %v4830_v47 }
 0x412   : > { %4509 = vmatpush3.bf16.msra.mxu1 %v4831_v48  ;;  %4488 = vmatprep.subr.bf16.mxu0 %v4832_v49  ;;  %v4854_v49 = vld [vmem:[#allocation9 + $0x100] sm:$0xff]  }
 0x413   : > { %4510 = vmatprep.subr.bf16.mxu1 %v4833_v52  ;;  %v4855_v52 = vld [vmem:[#allocation9 + $0x180] sm:$0xff]  }
 0x415   : > { %4489 = vmatpush3.bf16.msra.mxu0 %v4834_v54  ;;  %v4856_v54 = vld [vmem:[#allocation9 + $0x148] sm:$0xff]  }
 0x416   : > { %4511 = vmatpush3.bf16.msra.mxu1 %v4835_v58  ;;  %4490 = vmatprep.subr.bf16.mxu0 %v4836_v57  ;;  %v4857_v58 = vld [vmem:[#allocation9 + $0x1c8] sm:$0xff]  }
 0x417   : > { %4512 = vmatprep.subr.bf16.mxu1 %v4837_v55  ;;  %v4858_v57 = vld [vmem:[#allocation9 + $0x108] sm:$0xff]  }
 0x418   : > { %v4859_v55 = vld [vmem:[#allocation9 + $0x188] sm:$0xff]  }
 0x419   : > { %4491 = vmatpush3.bf16.msra.mxu0 %v4838_v56  ;;  %v4860_v56 = vld [vmem:[#allocation9 + $0x150] sm:$0xff]  }
 0x41a   : > { %4513 = vmatpush3.bf16.msra.mxu1 %v4839_v59  ;;  %4492 = vmatprep.subr.bf16.mxu0 %v4840_v60  ;;  %v4861_v59 = vld [vmem:[#allocation9 + $0x1d0] sm:$0xff]  }
 0x41b   : > { %4514 = vmatprep.subr.bf16.mxu1 %v4841_v61  ;;  %v4862_v60 = vld [vmem:[#allocation9 + $0x110] sm:$0xff]  }
 0x41c   : > { %v4863_v61 = vld [vmem:[#allocation9 + $0x190] sm:$0xff]  }
 0x41d   : > { %4493 = vmatpush3.bf16.msra.mxu0 %v4842_v62  ;;  %v4864_v62 = vld [vmem:[#allocation9 + $0x158] sm:$0xff]  }
 0x41e   : > { %4515 = vmatpush3.bf16.msra.mxu1 %v4843_v1  ;;  %4494 = vmatprep.subr.bf16.mxu0 %v4844_v63  ;;  %v4865_v1 = vld [vmem:[#allocation9 + $0x1d8] sm:$0xff]  }
 0x41f   : > { %4516 = vmatprep.subr.bf16.mxu1 %v4845_v2  ;;  %v4866_v63 = vld [vmem:[#allocation9 + $0x118] sm:$0xff]  }
 0x420   : > { %v4867_v2 = vld [vmem:[#allocation9 + $0x198] sm:$0xff]  }
 0x421   : > { %4495 = vmatpush3.bf16.msra.mxu0 %v4846_v3  ;;  %v4868_v3 = vld [vmem:[#allocation9 + $0x160] sm:$0xff]  }
 0x422   : > { %4517 = vmatpush3.bf16.msra.mxu1 %v4847_v4  ;;  %4496 = vmatprep.subr.bf16.mxu0 %v4848_v5  ;;  %v4869_v4 = vld [vmem:[#allocation9 + $0x1e0] sm:$0xff]  }
 0x423   : > { %4518 = vmatprep.subr.bf16.mxu1 %v4849_v6  ;;  %v4870_v5 = vld [vmem:[#allocation9 + $0x120] sm:$0xff]  }
 0x424   : > { %v4871_v6 = vld [vmem:[#allocation9 + $0x1a0] sm:$0xff]  }
 0x425   : > { %4497 = vmatpush3.bf16.msra.mxu0 %v4850_v7  ;;  %v4872_v7 = vld [vmem:[#allocation9 + $0x168] sm:$0xff]  }
 0x426   : > { %4519 = vmatpush3.bf16.msra.mxu1 %v4851_v11  ;;  %4526 = vmatprep.subr.bf16.mxu0 %v4852_v15  ;;  %v4873_v11 = vld [vmem:[#allocation9 + $0x1e8] sm:$0xff]  }
 0x427   : > { %4548 = vmatprep.subr.bf16.mxu1 %v4853_v17  ;;  %v4874_v15 = vld [vmem:[#allocation9 + $0x128] sm:$0xff]  }
 0x428   : > { %v4875_v17 = vld [vmem:[#allocation9 + $0x1a8] sm:$0xff]  }
 0x45b   : > { %v2926_v8 = vpop.f32.mrb[8].mxu0  ;;  %v3012_v9 = vpop.f32.mrb[8].mxu1 }
 0x45c   : > { %v4590_v10 = vadd.f32 %v2926_v8, %v1532_v20  ;;  %v4594_v12 = vadd.f32 %v3012_v9, %v1540_v21  ;;  %v2928_v13 = vpop.f32.mrb[9].mxu0  ;;  %v3014_v14 = vpop.f32.mrb[9].mxu1  ;;  %v4880_v8 = vld [vmem:[#allocation9 + $0x178] sm:$0xff]  }
 0x45d   : > { %v4591_v24 = vadd.f32 %v2928_v13, %v1536_v22  ;;  %v4595_v25 = vadd.f32 %v3014_v14, %v1544_v23  ;;  %v2930_v51 = vpop.f32.mrb[10].mxu0  ;;  %v3016_v26 = vpop.f32.mrb[10].mxu1  ;;  %v4881_v9 = vld [vmem:[#allocation9 + $0x1f8] sm:$0xff]   ;;  %v1547_v13 = vsub.s32 4, %v5296_v50  ;;  %v1555_v14 = vsub.s32 6, %v5296_v50 }
 0x45e   : > { %vm3193_vm15 = vcmp.gt.f32.partialorder %v4590_v10, 0.0  ;;  %v3209_v27 = vmul.f32 0.2, %v4590_v10  ;;  %vm3195_vm0 = vcmp.gt.f32.partialorder %v4594_v12, 0.0  ;;  %v3211_v16 = vmul.f32 0.2, %v4594_v12 }
 0x45f   : > { %vm3194_vm1 = vcmp.gt.f32.partialorder %v4591_v24, 0.0  ;;  %v3210_v53 = vmul.f32 0.2, %v4591_v24  ;;  %vm3196_vm2 = vcmp.gt.f32.partialorder %v4595_v25, 0.0  ;;  %v3212_v28 = vmul.f32 0.2, %v4595_v25 }
 0x460   : > { %v4592_v29 = vadd.f32 %v2930_v51, %v1532_v20  ;;  %v4596_v18 = vadd.f32 %v3016_v26, %v1540_v21  ;;  %v2932_v30 = vpop.f32.mrb[11].mxu0  ;;  %v3018_v31 = vpop.f32.mrb[11].mxu1  ;;  %v3225_v32 = vsel %vm3193_vm15, %v4590_v10, %v3209_v27  ;;  %v3227_v33 = vsel %vm3195_vm0, %v4594_v12, %v3211_v16  ;;  %v4876_v20 = vld [vmem:[#allocation9 + $0x170] sm:$0xff]   ;;  %v4882_v10 = vld [vmem:[#allocation9 + $0x138] sm:$0xff]  }
 0x461   : > { %v4593_v34 = vadd.f32 %v2932_v30, %v1536_v22  ;;  %v4597_v35 = vadd.f32 %v3018_v31, %v1544_v23  ;;  %v3226_v0 = vsel %vm3194_vm1, %v4591_v24, %v3210_v53  ;;  %v3228_v42 = vsel %vm3196_vm2, %v4595_v25, %v3212_v28  ;;  %v4877_v21 = vld [vmem:[#allocation9 + $0x1f0] sm:$0xff]   ;;  %v4883_v12 = vld [vmem:[#allocation9 + $0x1b8] sm:$0xff]  }
 0x462   : > { %vm3201_vm3 = vcmp.gt.f32.partialorder %v4592_v29, 0.0  ;;  %v3217_v36 = vmul.f32 0.2, %v4592_v29  ;;  %vm3203_vm4 = vcmp.gt.f32.partialorder %v4596_v18, 0.0  ;;  %v3219_v37 = vmul.f32 0.2, %v4596_v18 }
 0x463   : > { %vm3202_vm5 = vcmp.gt.f32.partialorder %v4593_v34, 0.0  ;;  %v3218_v38 = vmul.f32 0.2, %v4593_v34  ;;  %vm3204_vm6 = vcmp.gt.f32.partialorder %v4597_v35, 0.0  ;;  %v3220_v39 = vmul.f32 0.2, %v4597_v35 }
 0x464   : > { %v3233_v40 = vsel %vm3201_vm3, %v4592_v29, %v3217_v36  ;;  %v3235_v41 = vsel %vm3203_vm4, %v4596_v18, %v3219_v37  ;;  %v4878_v22 = vld [vmem:[#allocation9 + $0x130] sm:$0xff]   ;;  %v1551_v24 = vsub.s32 5, %v5296_v50  ;;  %v1559_v25 = vsub.s32 7, %v5296_v50 }
 0x465   : > { %v3241_v43 = vpack.c.bf16 %v3233_v40, %v3225_v32  ;;  %v3243_v44 = vpack.c.bf16 %v3235_v41, %v3227_v33  ;;  %v3234_v45 = vsel %vm3202_vm5, %v4593_v34, %v3218_v38  ;;  %v3236_v46 = vsel %vm3204_vm6, %v4597_v35, %v3220_v39  ;;  %v4879_v23 = vld [vmem:[#allocation9 + $0x1b0] sm:$0xff]  }
 0x466   : > { %v3242_v47 = vpack.c.bf16 %v3234_v45, %v3226_v0  ;;  %v3244_v48 = vpack.c.bf16 %v3236_v46, %v3228_v42  ;;  %v1548_v51 = vrot.slane %v5371_v19, %v1547_v13  ;;  %v1556_v26 = vrot.slane %v5371_v19, %v1555_v14 }
 0x467   : > { %v1552_v27 = vrot.slane %v5371_v19, %v1551_v24  ;;  %v1560_v16 = vrot.slane %v5371_v19, %v1559_v25 }
 0x468   : > { %3800 = vmatprep.mubr.bf16.mxu0 %v3242_v47  ;;  %3841 = vmatprep.mubr.bf16.mxu1 %v3244_v48 }
 0x469   : > { %3801 = vmatmul.mubr.bf16.vlgmr.msra.gmra.mrb[16].mxu0 %v3241_v43  ;;  %3842 = vmatmul.mubr.bf16.vlgmr.msra.gmra.mrb[16].mxu1 %v3243_v44 }
 0x46a   : > { %4527 = vmatpush3.bf16.msra.mxu0 %v4854_v49  ;;  %4549 = vmatpush3.bf16.msra.mxu1 %v4855_v52 }
 0x46b   : > { %4528 = vmatprep.subr.bf16.mxu0 %v4856_v54  ;;  %4550 = vmatprep.subr.bf16.mxu1 %v4857_v58 }
 0x46e   : > { %4529 = vmatpush3.bf16.msra.mxu0 %v4858_v57  ;;  %4551 = vmatpush3.bf16.msra.mxu1 %v4859_v55 }
 0x46f   : > { %4530 = vmatprep.subr.bf16.mxu0 %v4860_v56  ;;  %4552 = vmatprep.subr.bf16.mxu1 %v4861_v59 }
 0x472   : > { %4531 = vmatpush3.bf16.msra.mxu0 %v4862_v60  ;;  %4553 = vmatpush3.bf16.msra.mxu1 %v4863_v61 }
 0x473   : > { %4532 = vmatprep.subr.bf16.mxu0 %v4864_v62  ;;  %4554 = vmatprep.subr.bf16.mxu1 %v4865_v1 }
 0x476   : > { %4533 = vmatpush3.bf16.msra.mxu0 %v4866_v63  ;;  %4555 = vmatpush3.bf16.msra.mxu1 %v4867_v2  ;;  %v4406_v63 = vld [vmem:[%s5417_s10] ss:$0 sm:$0xff] }
 0x477   : > { %4534 = vmatprep.subr.bf16.mxu0 %v4868_v3  ;;  %4556 = vmatprep.subr.bf16.mxu1 %v4869_v4 }
 0x47a   : > { %4535 = vmatpush3.bf16.msra.mxu0 %v4870_v5  ;;  %4557 = vmatpush3.bf16.msra.mxu1 %v4871_v6 }
 0x47b   : > { %4536 = vmatprep.subr.bf16.mxu0 %v4872_v7  ;;  %4558 = vmatprep.subr.bf16.mxu1 %v4873_v11 }
 0x47e   : > { %4537 = vmatpush3.bf16.msra.mxu0 %v4874_v15  ;;  %4559 = vmatpush3.bf16.msra.mxu1 %v4875_v17 }
 0x47f   : > { %4538 = vmatprep.subr.bf16.mxu0 %v4876_v20  ;;  %4560 = vmatprep.subr.bf16.mxu1 %v4877_v21 }
 0x482   : > { %4539 = vmatpush3.bf16.msra.mxu0 %v4878_v22  ;;  %4561 = vmatpush3.bf16.msra.mxu1 %v4879_v23 }
 0x483   : > { %4540 = vmatprep.subr.bf16.mxu0 %v4880_v8  ;;  %4562 = vmatprep.subr.bf16.mxu1 %v4881_v9 }
 0x486   : > { %4541 = vmatpush3.bf16.msra.mxu0 %v4882_v10  ;;  %4563 = vmatpush3.bf16.msra.mxu1 %v4883_v12 }
 0x4db   : > { %v3098_v53 = vpop.f32.mrb[12].mxu0 }
 0x4dc   : > { %v4598_v28 = vadd.f32 %v3098_v53, %v1548_v51  ;;  %v3184_v29 = vpop.f32.mrb[12].mxu1  ;;  %v3100_v18 = vpop.f32.mrb[13].mxu0 }
 0x4dd   : > { %v4602_v30 = vadd.f32 %v3184_v29, %v1556_v26  ;;  %v4599_v31 = vadd.f32 %v3100_v18, %v1552_v27  ;;  %v3186_v32 = vpop.f32.mrb[13].mxu1  ;;  %v3102_v33 = vpop.f32.mrb[14].mxu0 }
 0x4de   : > { %v3213_v34 = vmul.f32 0.2, %v4598_v28  ;;  %v4603_v35 = vadd.f32 %v3186_v32, %v1560_v16  ;;  %v4600_v36 = vadd.f32 %v3102_v33, %v1548_v51  ;;  %v3188_v50 = vpop.f32.mrb[14].mxu1  ;;  %v3104_v37 = vpop.f32.mrb[15].mxu0  ;;  %vm3197_vm7 = vcmp.gt.f32.partialorder %v4598_v28, 0.0 }
 0x4df   : > { %vm3199_vm8 = vcmp.gt.f32.partialorder %v4602_v30, 0.0  ;;  %v3215_v38 = vmul.f32 0.2, %v4602_v30  ;;  %vm3198_vm9 = vcmp.gt.f32.partialorder %v4599_v31, 0.0  ;;  %v3190_v39 = vpop.f32.mrb[15].mxu1  ;;  %v4604_v41 = vadd.f32 %v3188_v50, %v1556_v26 }
 0x4e0   : > { %vm3205_vm10 = vcmp.gt.f32.partialorder %v4600_v36, 0.0  ;;  %v3214_v19 = vmul.f32 0.2, %v4599_v31  ;;  %v3221_v40 = vmul.f32 0.2, %v4600_v36  ;;  %v4601_v0 = vadd.f32 %v3104_v37, %v1552_v27 }
 0x4e1   : > { %v3229_v42 = vsel %vm3197_vm7, %v4598_v28, %v3213_v34  ;;  %vm3200_vm11 = vcmp.gt.f32.partialorder %v4603_v35, 0.0  ;;  %v3216_v43 = vmul.f32 0.2, %v4603_v35  ;;  %v4605_v44 = vadd.f32 %v3190_v39, %v1560_v16 }
 0x4e2   : > { %v3237_v45 = vsel %vm3205_vm10, %v4600_v36, %v3221_v40  ;;  %vm3207_vm12 = vcmp.gt.f32.partialorder %v4604_v41, 0.0  ;;  %v3223_v46 = vmul.f32 0.2, %v4604_v41  ;;  %vm3206_vm13 = vcmp.gt.f32.partialorder %v4601_v0, 0.0 }
 0x4e3   : > { %v3245_v47 = vpack.c.bf16 %v3237_v45, %v3229_v42  ;;  %v3222_v48 = vmul.f32 0.2, %v4601_v0  ;;  %vm3208_vm14 = vcmp.gt.f32.partialorder %v4605_v44, 0.0  ;;  %v3224_v49 = vmul.f32 0.2, %v4605_v44 }
 0x4e4   : > { %v3231_v52 = vsel %vm3199_vm8, %v4602_v30, %v3215_v38  ;;  %v3239_v54 = vsel %vm3207_vm12, %v4604_v41, %v3223_v46  ;;  %v3230_v58 = vsel %vm3198_vm9, %v4599_v31, %v3214_v19  ;;  %v3232_v56 = vsel %vm3200_vm11, %v4603_v35, %v3216_v43 }
 0x4e5   : > { %v3247_v57 = vpack.c.bf16 %v3239_v54, %v3231_v52  ;;  %v3238_v55 = vsel %vm3206_vm13, %v4601_v0, %v3222_v48  ;;  %v3240_v59 = vsel %vm3208_vm14, %v4605_v44, %v3224_v49 }
 0x4e6   : > { %v3246_v60 = vpack.c.bf16 %v3238_v55, %v3230_v58  ;;  %v3248_v61 = vpack.c.bf16 %v3240_v59, %v3232_v56 }
 0x4e8   : > { %3882 = vmatprep.mubr.bf16.mxu0 %v3246_v60  ;;  %3923 = vmatprep.mubr.bf16.mxu1 %v3248_v61 }
 0x4e9   : > { %3883 = vmatmul.mubr.bf16.vlgmr.msra.gmra.mrb[20].mxu0 %v3245_v47  ;;  %3924 = vmatmul.mubr.bf16.vlgmr.msra.gmra.mrb[20].mxu1 %v3247_v57 }
 0x53c   : > { %v4498_v62 = vpop.f32.mrb[16].mxu0  ;;  %v4520_v1 = vpop.f32.mrb[16].mxu1 }
 0x53d   : > { %v4499_v2 = vpop.f32.mrb[17].mxu0  ;;  %v4521_v3 = vpop.f32.mrb[17].mxu1 }
 0x53e   : > { %v4500_v4 = vadd.f32 %v4499_v2, %v4498_v62  ;;  %v4522_v5 = vadd.f32 %v4521_v3, %v4520_v1  ;;  %v4501_v6 = vpop.f32.mrb[18].mxu0  ;;  %v4523_v7 = vpop.f32.mrb[18].mxu1 }
 0x53f   : > { %v4502_v11 = vpop.f32.mrb[19].mxu0  ;;  %v4524_v15 = vpop.f32.mrb[19].mxu1 }
 0x540   : > { %v3803_v17 = vadd.f32 %v4500_v4, %v4406_v63  ;;  %v4503_v20 = vadd.f32 %v4502_v11, %v4501_v6  ;;  %v4525_v21 = vadd.f32 %v4524_v15, %v4523_v7 }
 0x542   : > { %v3844_v22 = vadd.f32 %v4522_v5, %v3803_v17  ;;  %v3806_v23 = vadd.f32 %v4503_v20, %v4406_v63 }
 0x544   : > { %v3847_v8 = vadd.f32 %v4525_v21, %v3806_v23 }
 0x5bc   : > { %v4542_v9 = vpop.f32.mrb[20].mxu0  ;;  %v4564_v10 = vpop.f32.mrb[20].mxu1 }
 0x5bd   : > { %v4543_v12 = vpop.f32.mrb[21].mxu0  ;;  %v4565_v13 = vpop.f32.mrb[21].mxu1 }
 0x5be   : > { %v4544_v14 = vadd.f32 %v4543_v12, %v4542_v9  ;;  %v4566_v24 = vadd.f32 %v4565_v13, %v4564_v10  ;;  %v4545_v25 = vpop.f32.mrb[22].mxu0  ;;  %v4567_v51 = vpop.f32.mrb[22].mxu1 }
 0x5bf   : > { %v4546_v26 = vpop.f32.mrb[23].mxu0  ;;  %v4568_v27 = vpop.f32.mrb[23].mxu1 }
 0x5c0   : > { %v3885_v16 = vadd.f32 %v4544_v14, %v3844_v22  ;;  %v4547_v53 = vadd.f32 %v4546_v26, %v4545_v25  ;;  %v4569_v28 = vadd.f32 %v4568_v27, %v4567_v51 }
 0x5c2   : > { %v3926_v29 = vadd.f32 %v4566_v24, %v3885_v16  ;;  %v3888_v18 = vadd.f32 %v4547_v53, %v3847_v8 }
 0x5c4   : > { %4884 = vtanh.f32 %v3926_v29  ;;  %v3929_v30 = vadd.f32 %v4569_v28, %v3888_v18 }
 0x5c6   : > { %4886 = vtanh.f32 %v3929_v30 }
 0x5ce   : > { %v4885_v31 = vpop.eup %4884 }
 0x5cf   : > { %3934 = vst [vmem:[%s461_s22] sm:$0xff] %v4885_v31 }
 0x5d0   : > { %v4887_v32 = vpop.eup %4886 }
 0x5d1   : > { %3935 = vst [vmem:[%s461_s22 + $0x8] sm:$0xff] %v4887_v32 }
 0x5d2 PF: > { %s24_s17 = sadd.s32 1, %s5046_s17  }
 0x5d3   : > { %p21_p3 = scmp.ge.s32.totalorder %s24_s17, 4  }
 0x5d5   :  { %23 = sbr.rel (!%p21_p3) target bundleno = 3 (0x3), region = 115 }
 0x5dc   :  { %3958 = vsyncpa [#allocation3], 1 }
 0x5dd   :  { %3960 = vsyncpa [#allocation3 + $0x1], 1 }
 0x5de   :  { %3961 = vsyncpa [#allocation5], 1 }
 0x5df   :  { %3962 = vsyncpa [#allocation8], 1 }

</bundles_post_ra>
